<compile_context>
chip_gen: v7x
topology: tpu7x:2x2x1
jax: 0.10.0
libtpu: 0.0.40
codegen_flags: <defaults>
</compile_context>

<pallas_src>
import math

import jax
import jax.numpy as jnp
from jax.experimental import pallas as pl
from jax.experimental.pallas import tpu as pltpu

# ---------------- tiny synthetic "BERT" config ----------------
VOCAB      = 128
MAX_POS    = 64
HIDDEN     = 32
N_HEADS    = 2
HEAD_DIM   = HIDDEN // N_HEADS
INTER      = 4 * HIDDEN
N_LAYERS   = 2
N_CLASSES  = 3
N_PAD      = 128            # lane-dense padded logits width (sliced to N_CLASSES outside)
LN_EPS     = 1e-12
ATTN_SCALE = 1.0 / math.sqrt(HEAD_DIM)

B = 2   # batch
S = 8   # sequence length


# ---------------- in-kernel helpers ----------------
def _layernorm(x, g, b):
    # f32 statistics (keep LN math in f32 even with bf16 matmuls).
    mu = jnp.mean(x, axis=-1, keepdims=True)
    var = jnp.mean((x - mu) ** 2, axis=-1, keepdims=True)
    return (x - mu) * jax.lax.rsqrt(var + LN_EPS) * g + b


# ---------------- single fused kernel: whole model ----------------
def _fused_bert_kernel(
    x_emb_ref, emb_g_ref, emb_b_ref, mask_ref,
    wqkv_ref, bqkv_ref, wo_ref, bo_ref, ln1g_ref, ln1b_ref,
    wi_ref, bi_ref, wo2_ref, bo2_ref, ln2g_ref, ln2b_ref,
    pool_w_ref, pool_b_ref, fc_w_ref, fc_b_ref,
    out_ref, act_ref):
    layer = pl.program_id(0)

    # ---- grid step 0: embedding LayerNorm (no residual), activations -> VMEM scratch ----
    @pl.when(layer == 0)
    def _():
        act_ref[...] = _layernorm(x_emb_ref[...], emb_g_ref[...], emb_b_ref[...])

    x = act_ref[...]                                   # (B*S, H) f32, VMEM-resident

    # ---- fused QKV projection (bf16 operands, f32 accumulate) ----
    qkv = jnp.dot(x.astype(jnp.bfloat16), wqkv_ref[...],
                  preferred_element_type=jnp.float32) + bqkv_ref[...]
    q = qkv[:, :HIDDEN] * ATTN_SCALE                   # fold 1/sqrt(dh) into q
    k = qkv[:, HIDDEN:2 * HIDDEN]
    v = qkv[:, 2 * HIDDEN:]
    mask = mask_ref[...]                               # (B, S) additive bias, f32

    # ---- multi-head attention; head split/merge done in-kernel on VMEM values ----
    ctx_rows = []
    for b in range(B):
        q_b = q[b * S:(b + 1) * S, :]
        k_b = k[b * S:(b + 1) * S, :]
        v_b = v[b * S:(b + 1) * S, :]
        bias_b = mask[b:b + 1, :]                      # (1, S) broadcast over query rows
        heads = []
        for h in range(N_HEADS):
            lo, hi = h * HEAD_DIM, (h + 1) * HEAD_DIM
            qh = q_b[:, lo:hi].astype(jnp.bfloat16)
            kh = k_b[:, lo:hi].astype(jnp.bfloat16)
            vh = v_b[:, lo:hi].astype(jnp.bfloat16)
            s = jax.lax.dot_general(qh, kh, (((1,), (1,)), ((), ())),
                                    preferred_element_type=jnp.float32)   # (S, S) f32
            s = s + bias_b                             # mask add in f32
            s = s - jnp.max(s, axis=-1, keepdims=True)
            p = jnp.exp(s)
            p = p * pl.reciprocal(jnp.sum(p, axis=-1, keepdims=True), approx=True)
            heads.append(jnp.dot(p.astype(jnp.bfloat16), vh,
                                 preferred_element_type=jnp.float32))     # (S, dh)
        ctx_rows.append(jnp.concatenate(heads, axis=-1))                  # (S, H)
    ctx = jnp.concatenate(ctx_rows, axis=0)                               # (B*S, H)

    # ---- attention output projection + residual + LN (dropout -> identity, eval) ----
    attn_out = jnp.dot(ctx.astype(jnp.bfloat16), wo_ref[...],
                       preferred_element_type=jnp.float32) + bo_ref[...]
    x = _layernorm(attn_out + x, ln1g_ref[...], ln1b_ref[...])

    # ---- FFN + residual + LN ----
    h_mid = jnp.dot(x.astype(jnp.bfloat16), wi_ref[...],
                    preferred_element_type=jnp.float32) + bi_ref[...]
    # TODO(synk): HF BERT uses exact erf-GELU; tanh approximation used here.
    h_mid = jax.nn.gelu(h_mid, approximate=True)
    ffn_out = jnp.dot(h_mid.astype(jnp.bfloat16), wo2_ref[...],
                      preferred_element_type=jnp.float32) + bo2_ref[...]
    x = _layernorm(ffn_out + x, ln2g_ref[...], ln2b_ref[...])
    act_ref[...] = x

    # ---- last grid step: pooler -> Dropout(p=0.3, eval=identity) -> fc ----
    @pl.when(layer == pl.num_programs(0) - 1)
    def _():
        cls = jnp.concatenate([x[b * S:b * S + 1, :] for b in range(B)], axis=0)  # (B, H)
        pooled = jnp.tanh(
            jnp.dot(cls.astype(jnp.bfloat16), pool_w_ref[...],
                    preferred_element_type=jnp.float32) + pool_b_ref[...])
        logits = jnp.dot(pooled.astype(jnp.bfloat16), fc_w_ref[...],
                         preferred_element_type=jnp.float32) + fc_b_ref[...]      # (B, N_PAD)
        out_ref[...] = logits


# ---------------- wrapper ----------------
def nn_classifier_forward(input_ids, attention_mask, pp):
    Bq, Sq = input_ids.shape
    # Embedding gathers stay in plain JAX (glue); sums feed the fused kernel.
    we = jnp.take(pp["word_emb"], input_ids, axis=0)               # (B,S,H)
    pe = pp["pos_emb"][:Sq][None, :, :]
    te = pp["type_emb"][0][None, None, :]                          # token_type_ids == 0
    x_emb = (we + pe + te).reshape(Bq * Sq, HIDDEN).astype(jnp.float32)
    mask_bias = (1.0 - attention_mask.astype(jnp.float32)) * -1e9  # (B,S) additive bias

    def lay3(r, c):   # per-layer stacked weight, selected by the layer grid index
        return pl.BlockSpec((pl.Squeezed(), r, c), lambda l: (l, 0, 0))

    def const2(r, c):  # same block every layer step -> stays resident in VMEM
        return pl.BlockSpec((r, c), lambda l: (0, 0))

    logits_pad = pl.pallas_call(
        _fused_bert_kernel,
        grid=(N_LAYERS,),
        out_shape=jax.ShapeDtypeStruct((Bq, N_PAD), jnp.float32),
        in_specs=[
            const2(Bq * Sq, HIDDEN),      # x_emb
            const2(1, HIDDEN),            # emb_ln_g
            const2(1, HIDDEN),            # emb_ln_b
            const2(Bq, Sq),               # mask_bias
            lay3(HIDDEN, 3 * HIDDEN),     # wqkv (fused)
            lay3(1, 3 * HIDDEN),          # bqkv
            lay3(HIDDEN, HIDDEN),         # wo
            lay3(1, HIDDEN),              # bo
            lay3(1, HIDDEN),              # ln1_g
            lay3(1, HIDDEN),              # ln1_b
            lay3(HIDDEN, INTER),          # wi
            lay3(1, INTER),               # bi
            lay3(INTER, HIDDEN),          # wo2
            lay3(1, HIDDEN),              # bo2
            lay3(1, HIDDEN),              # ln2_g
            lay3(1, HIDDEN),              # ln2_b
            const2(HIDDEN, HIDDEN),       # pool_w
            const2(1, HIDDEN),            # pool_b
            const2(HIDDEN, N_PAD),        # fc_w (zero-padded to 128 lanes)
            const2(1, N_PAD),             # fc_b
        ],
        out_specs=pl.BlockSpec((Bq, N_PAD), lambda l: (0, 0)),
        scratch_shapes=[pltpu.VMEM((Bq * Sq, HIDDEN), jnp.float32)],
        compiler_params=pltpu.CompilerParams(dimension_semantics=("arbitrary",)),
    )(x_emb, pp["emb_ln_g"], pp["emb_ln_b"], mask_bias,
      pp["wqkv"], pp["bqkv"], pp["wo"], pp["bo"], pp["ln1_g"], pp["ln1_b"],
      pp["wi"], pp["bi"], pp["wo2"], pp["bo2"], pp["ln2_g"], pp["ln2_b"],
      pp["pool_w"], pp["pool_b"], pp["fc_w"], pp["fc_b"])
    return logits_pad[:, :N_CLASSES]


# ---------------- deterministic parameter init + packing ----------------
def init_params(key):
    keys = iter(jax.random.split(key, 8 + 10 * N_LAYERS))

    def w(shape):
        return (0.02 * jax.random.normal(next(keys), shape)).astype(jnp.float32)

    def zeros(n): return jnp.zeros((n,), jnp.float32)
    def ones(n):  return jnp.ones((n,), jnp.float32)

    params = {
        "word_emb": w((VOCAB, HIDDEN)),
        "pos_emb": w((MAX_POS, HIDDEN)),
        "type_emb": w((2, HIDDEN)),
        "emb_ln_g": ones(HIDDEN), "emb_ln_b": zeros(HIDDEN),
        "layers": [],
        "pool_w": w((HIDDEN, HIDDEN)), "pool_b": zeros(HIDDEN),
        "fc_w": w((HIDDEN, N_CLASSES)), "fc_b": zeros(N_CLASSES),
    }
    for _ in range(N_LAYERS):
        params["layers"].append({
            "wq": w((HIDDEN, HIDDEN)), "bq": zeros(HIDDEN),
            "wk": w((HIDDEN, HIDDEN)), "bk": zeros(HIDDEN),
            "wv": w((HIDDEN, HIDDEN)), "bv": zeros(HIDDEN),
            "wo": w((HIDDEN, HIDDEN)), "bo": zeros(HIDDEN),
            "ln1_g": ones(HIDDEN), "ln1_b": zeros(HIDDEN),
            "wi": w((HIDDEN, INTER)), "bi": zeros(INTER),
            "wo2": w((INTER, HIDDEN)), "bo2": zeros(HIDDEN),
            "ln2_g": ones(HIDDEN), "ln2_b": zeros(HIDDEN),
        })
    return params


def pack_params(p):
    """Stack per-layer weights on a leading layer axis; matmul weights -> bf16."""
    def stack(name):
        return jnp.stack([lp[name] for lp in p["layers"]])

    wqkv = jnp.stack([jnp.concatenate([lp["wq"], lp["wk"], lp["wv"]], axis=1)
                      for lp in p["layers"]]).astype(jnp.bfloat16)           # (L,H,3H)
    bqkv = jnp.stack([jnp.concatenate([lp["bq"], lp["bk"], lp["bv"]])
                      for lp in p["layers"]])[:, None, :]                    # (L,1,3H)
    return {
        "word_emb": p["word_emb"], "pos_emb": p["pos_emb"], "type_emb": p["type_emb"],
        "emb_ln_g": p["emb_ln_g"].reshape(1, HIDDEN),
        "emb_ln_b": p["emb_ln_b"].reshape(1, HIDDEN),
        "wqkv": wqkv, "bqkv": bqkv,
        "wo": stack("wo").astype(jnp.bfloat16),  "bo": stack("bo")[:, None, :],
        "ln1_g": stack("ln1_g")[:, None, :],     "ln1_b": stack("ln1_b")[:, None, :],
        "wi": stack("wi").astype(jnp.bfloat16),  "bi": stack("bi")[:, None, :],
        "wo2": stack("wo2").astype(jnp.bfloat16),"bo2": stack("bo2")[:, None, :],
        "ln2_g": stack("ln2_g")[:, None, :],     "ln2_b": stack("ln2_b")[:, None, :],
        "pool_w": p["pool_w"].astype(jnp.bfloat16),
        "pool_b": p["pool_b"].reshape(1, HIDDEN),
        "fc_w": jnp.pad(p["fc_w"], ((0, 0), (0, N_PAD - N_CLASSES))).astype(jnp.bfloat16),
        "fc_b": jnp.pad(p["fc_b"], (0, N_PAD - N_CLASSES)).reshape(1, N_PAD),
    }


# ---------------- pure-JAX reference (f32) ----------------
def _ln_ref(x, g, b):
    mu = jnp.mean(x, axis=-1, keepdims=True)
    var = jnp.mean((x - mu) ** 2, axis=-1, keepdims=True)
    return (x - mu) * jax.lax.rsqrt(var + LN_EPS) * g + b


def reference_forward(input_ids, attention_mask, params):
    we = jnp.take(params["word_emb"], input_ids, axis=0)
    pe = params["pos_emb"][:S][None]
    te = params["type_emb"][0][None, None]
    x = _ln_ref(we + pe + te, params["emb_ln_g"], params["emb_ln_b"])
    mask_bias = (1.0 - attention_mask.astype(jnp.float32)) * -1e9
    for lp in params["layers"]:
        q = x @ lp["wq"] + lp["bq"]
        k = x @ lp["wk"] + lp["bk"]
        v = x @ lp["wv"] + lp["bv"]
        def split(t):
            return t.reshape(B, S, N_HEADS, HEAD_DIM).transpose(0, 2, 1, 3)
        qh, kh, vh = split(q), split(k), split(v)
        s = jnp.einsum("bhqd,bhkd->bhqk", qh, kh) * ATTN_SCALE
        s = s + mask_bias[:, None, None, :]
        p = jax.nn.softmax(s, axis=-1)
        ctx = jnp.einsum("bhqk,bhkd->bhqd", p, vh).transpose(0, 2, 1, 3).reshape(B, S, HIDDEN)
        x = _ln_ref(ctx @ lp["wo"] + lp["bo"] + x, lp["ln1_g"], lp["ln1_b"])
        h = jax.nn.gelu(x @ lp["wi"] + lp["bi"], approximate=True)
        x = _ln_ref(h @ lp["wo2"] + lp["bo2"] + x, lp["ln2_g"], lp["ln2_b"])
    cls = x[:, 0, :]
    pooled = jnp.tanh(cls @ params["pool_w"] + params["pool_b"])
    return pooled @ params["fc_w"] + params["fc_b"]


if __name__ == "__main__":
    key = jax.random.PRNGKey(0)
    k_param, k_ids = jax.random.split(key)
    params = init_params(k_param)
    packed = pack_params(params)

    input_ids = jax.random.randint(k_ids, (B, S), 0, VOCAB, dtype=jnp.int32)
    attention_mask = jnp.array([[1, 1, 1, 1, 1, 1, 1, 1],
                                [1, 1, 1, 1, 1, 1, 0, 0]], dtype=jnp.int32)

    fwd = jax.jit(nn_classifier_forward)
    logits = fwd(input_ids, attention_mask, packed)
    jax.block_until_ready(logits)

    assert logits.shape == (B, N_CLASSES) and logits.dtype == jnp.float32

    ref = reference_forward(input_ids, attention_mask, params)
    assert jnp.allclose(logits, ref, atol=2e-2, rtol=0.0), (
        f"max abs diff {float(jnp.max(jnp.abs(logits - ref)))}")

    print("KERNEL_OK")
</pallas_src>

<mosaic_0001>
module attributes {stable_mosaic.version = 11 : i64} {
  func.func @_fused_bert_kernel(%arg0: i32, %arg1: memref<16x32xf32, #tpu.memory_space<vmem>>, %arg2: memref<1x32xf32, #tpu.memory_space<vmem>>, %arg3: memref<1x32xf32, #tpu.memory_space<vmem>>, %arg4: memref<2x8xf32, #tpu.memory_space<vmem>>, %arg5: memref<1x32x96xbf16, #tpu.memory_space<vmem>>, %arg6: memref<1x1x96xf32, #tpu.memory_space<vmem>>, %arg7: memref<1x32x32xbf16, #tpu.memory_space<vmem>>, %arg8: memref<1x1x32xf32, #tpu.memory_space<vmem>>, %arg9: memref<1x1x32xf32, #tpu.memory_space<vmem>>, %arg10: memref<1x1x32xf32, #tpu.memory_space<vmem>>, %arg11: memref<1x32x128xbf16, #tpu.memory_space<vmem>>, %arg12: memref<1x1x128xf32, #tpu.memory_space<vmem>>, %arg13: memref<1x128x32xbf16, #tpu.memory_space<vmem>>, %arg14: memref<1x1x32xf32, #tpu.memory_space<vmem>>, %arg15: memref<1x1x32xf32, #tpu.memory_space<vmem>>, %arg16: memref<1x1x32xf32, #tpu.memory_space<vmem>>, %arg17: memref<32x32xbf16, #tpu.memory_space<vmem>>, %arg18: memref<1x32xf32, #tpu.memory_space<vmem>>, %arg19: memref<32x128xbf16, #tpu.memory_space<vmem>>, %arg20: memref<1x128xf32, #tpu.memory_space<vmem>>, %arg21: memref<2x128xf32, #tpu.memory_space<vmem>>, %arg22: memref<16x32xf32, #tpu.memory_space<vmem>>) attributes {dimension_semantics = [#tpu.dimension_semantics<arbitrary>], iteration_bounds = array<i64: 2>, scalar_prefetch = 0 : i64, scratch_operands = 1 : i64, tpu.core_type = #tpu.core_type<tc>, window_params = [{pipeline_mode = #tpu.pipeline_mode<synchronous>, transform_indices = @transform_0, window_bounds = array<i64: 16, 32>}, {pipeline_mode = #tpu.pipeline_mode<synchronous>, transform_indices = @transform_1, window_bounds = array<i64: 1, 32>}, {pipeline_mode = #tpu.pipeline_mode<synchronous>, transform_indices = @transform_2, window_bounds = array<i64: 1, 32>}, {pipeline_mode = #tpu.pipeline_mode<synchronous>, transform_indices = @transform_3, window_bounds = array<i64: 2, 8>}, {transform_indices = @transform_4, window_bounds = array<i64: 1, 32, 96>}, {transform_indices = @transform_5, window_bounds = array<i64: 1, 1, 96>}, {transform_indices = @transform_6, window_bounds = array<i64: 1, 32, 32>}, {transform_indices = @transform_7, window_bounds = array<i64: 1, 1, 32>}, {transform_indices = @transform_8, window_bounds = array<i64: 1, 1, 32>}, {transform_indices = @transform_9, window_bounds = array<i64: 1, 1, 32>}, {transform_indices = @transform_10, window_bounds = array<i64: 1, 32, 128>}, {transform_indices = @transform_11, window_bounds = array<i64: 1, 1, 128>}, {transform_indices = @transform_12, window_bounds = array<i64: 1, 128, 32>}, {transform_indices = @transform_13, window_bounds = array<i64: 1, 1, 32>}, {transform_indices = @transform_14, window_bounds = array<i64: 1, 1, 32>}, {transform_indices = @transform_15, window_bounds = array<i64: 1, 1, 32>}, {pipeline_mode = #tpu.pipeline_mode<synchronous>, transform_indices = @transform_16, window_bounds = array<i64: 32, 32>}, {pipeline_mode = #tpu.pipeline_mode<synchronous>, transform_indices = @transform_17, window_bounds = array<i64: 1, 32>}, {pipeline_mode = #tpu.pipeline_mode<synchronous>, transform_indices = @transform_18, window_bounds = array<i64: 32, 128>}, {pipeline_mode = #tpu.pipeline_mode<synchronous>, transform_indices = @transform_19, window_bounds = array<i64: 1, 128>}, {pipeline_mode = #tpu.pipeline_mode<synchronous>, transform_indices = @transform_20, window_bounds = array<i64: 2, 128>}]} {
    %c0_i32 = arith.constant 0 : i32
    %0 = arith.cmpi eq, %arg0, %c0_i32 : i32
    %1 = arith.extui %0 : i1 to i32
    %c0_i32_0 = arith.constant 0 : i32
    %2 = arith.cmpi ne, %1, %c0_i32_0 : i32
    scf.if %2 {
      %c0_77 = arith.constant 0 : index
      %c0_78 = arith.constant 0 : index
      %208 = vector.load %arg1[%c0_77, %c0_78] : memref<16x32xf32, #tpu.memory_space<vmem>>, vector<16x32xf32>
      %c0_79 = arith.constant 0 : index
      %c0_80 = arith.constant 0 : index
      %209 = vector.load %arg2[%c0_79, %c0_80] : memref<1x32xf32, #tpu.memory_space<vmem>>, vector<1x32xf32>
      %c0_81 = arith.constant 0 : index
      %c0_82 = arith.constant 0 : index
      %210 = vector.load %arg3[%c0_81, %c0_82] : memref<1x32xf32, #tpu.memory_space<vmem>>, vector<1x32xf32>
      %cst_83 = arith.constant dense<0.000000e+00> : vector<16xf32>
      %211 = vector.multi_reduction <add>, %208, %cst_83 [1] : vector<16x32xf32> to vector<16xf32>
      %212 = vector.shape_cast %211 : vector<16xf32> to vector<16x1xf32>
      %cst_84 = arith.constant 3.200000e+01 : f32
      %213 = vector.broadcast %cst_84 : f32 to vector<16x1xf32>
      %214 = arith.divf %212, %213 : vector<16x1xf32>
      %215 = vector.broadcast %214 : vector<16x1xf32> to vector<16x32xf32>
      %216 = arith.subf %208, %215 : vector<16x32xf32>
      %217 = arith.mulf %216, %216 : vector<16x32xf32>
      %cst_85 = arith.constant dense<0.000000e+00> : vector<16xf32>
      %218 = vector.multi_reduction <add>, %217, %cst_85 [1] : vector<16x32xf32> to vector<16xf32>
      %219 = vector.shape_cast %218 : vector<16xf32> to vector<16x1xf32>
      %cst_86 = arith.constant 3.200000e+01 : f32
      %220 = vector.broadcast %cst_86 : f32 to vector<16x1xf32>
      %221 = arith.divf %219, %220 : vector<16x1xf32>
      %222 = vector.broadcast %214 : vector<16x1xf32> to vector<16x32xf32>
      %223 = arith.subf %208, %222 : vector<16x32xf32>
      %cst_87 = arith.constant 9.99999996E-13 : f32
      %224 = vector.broadcast %cst_87 : f32 to vector<16x1xf32>
      %225 = arith.addf %221, %224 : vector<16x1xf32>
      %226 = math.rsqrt %225 : vector<16x1xf32>
      %227 = vector.broadcast %226 : vector<16x1xf32> to vector<16x32xf32>
      %228 = arith.mulf %223, %227 : vector<16x32xf32>
      %229 = vector.broadcast %209 : vector<1x32xf32> to vector<16x32xf32>
      %230 = arith.mulf %228, %229 : vector<16x32xf32>
      %231 = vector.broadcast %210 : vector<1x32xf32> to vector<16x32xf32>
      %232 = arith.addf %230, %231 : vector<16x32xf32>
      %c0_88 = arith.constant 0 : index
      %c0_89 = arith.constant 0 : index
      %233 = vector.load %arg22[%c0_88, %c0_89] : memref<16x32xf32, #tpu.memory_space<vmem>>, vector<16x32xf32>
      tpu.vector_store %arg22[%c0_88, %c0_89], %232 {strides = array<i32>} : memref<16x32xf32, #tpu.memory_space<vmem>>, vector<16x32xf32>,
    } else {
    }
    %c0 = arith.constant 0 : index
    %c0_1 = arith.constant 0 : index
    %3 = vector.load %arg22[%c0, %c0_1] : memref<16x32xf32, #tpu.memory_space<vmem>>, vector<16x32xf32>
    %4 = arith.truncf %3 : vector<16x32xf32> to vector<16x32xbf16>
    %c0_2 = arith.constant 0 : index
    %c0_3 = arith.constant 0 : index
    %c0_4 = arith.constant 0 : index
    %5 = vector.load %arg5[%c0_2, %c0_3, %c0_4] : memref<1x32x96xbf16, #tpu.memory_space<vmem>>, vector<1x32x96xbf16>
    %6 = vector.shape_cast %5 : vector<1x32x96xbf16> to vector<32x96xbf16>
    %cst = arith.constant dense<0.000000e+00> : vector<16x96xf32>
    %7 = tpu.matmul %4, %6, %cst {dimension_numbers = #tpu.dot_dimension_numbers<[1], [0], [0], [1], [0, 0, 1, 1], [], []>} : vector<16x32xbf16>, vector<32x96xbf16>, vector<16x96xf32> -> vector<16x96xf32>
    %c0_5 = arith.constant 0 : index
    %c0_6 = arith.constant 0 : index
    %c0_7 = arith.constant 0 : index
    %8 = vector.load %arg6[%c0_5, %c0_6, %c0_7] : memref<1x1x96xf32, #tpu.memory_space<vmem>>, vector<1x1x96xf32>
    %9 = vector.shape_cast %8 : vector<1x1x96xf32> to vector<1x96xf32>
    %10 = vector.broadcast %9 : vector<1x96xf32> to vector<16x96xf32>
    %11 = arith.addf %7, %10 : vector<16x96xf32>
    %12 = vector.extract_strided_slice %11 {offsets = [0, 0], sizes = [16, 32], strides = [1, 1]} : vector<16x96xf32> to vector<16x32xf32>
    %cst_8 = arith.constant 2.500000e-01 : f32
    %13 = vector.broadcast %cst_8 : f32 to vector<16x32xf32>
    %14 = arith.mulf %12, %13 : vector<16x32xf32>
    %15 = vector.extract_strided_slice %11 {offsets = [0, 32], sizes = [16, 32], strides = [1, 1]} : vector<16x96xf32> to vector<16x32xf32>
    %16 = vector.extract_strided_slice %11 {offsets = [0, 64], sizes = [16, 32], strides = [1, 1]} : vector<16x96xf32> to vector<16x32xf32>
    %c0_9 = arith.constant 0 : index
    %c0_10 = arith.constant 0 : index
    %17 = vector.load %arg4[%c0_9, %c0_10] : memref<2x8xf32, #tpu.memory_space<vmem>>, vector<2x8xf32>
    %18 = vector.extract_strided_slice %14 {offsets = [0, 0], sizes = [8, 32], strides = [1, 1]} : vector<16x32xf32> to vector<8x32xf32>
    %19 = vector.extract_strided_slice %15 {offsets = [0, 0], sizes = [8, 32], strides = [1, 1]} : vector<16x32xf32> to vector<8x32xf32>
    %20 = vector.extract_strided_slice %16 {offsets = [0, 0], sizes = [8, 32], strides = [1, 1]} : vector<16x32xf32> to vector<8x32xf32>
    %21 = vector.extract_strided_slice %17 {offsets = [0, 0], sizes = [1, 8], strides = [1, 1]} : vector<2x8xf32> to vector<1x8xf32>
    %22 = vector.extract_strided_slice %18 {offsets = [0, 0], sizes = [8, 16], strides = [1, 1]} : vector<8x32xf32> to vector<8x16xf32>
    %23 = arith.truncf %22 : vector<8x16xf32> to vector<8x16xbf16>
    %24 = vector.extract_strided_slice %19 {offsets = [0, 0], sizes = [8, 16], strides = [1, 1]} : vector<8x32xf32> to vector<8x16xf32>
    %25 = arith.truncf %24 : vector<8x16xf32> to vector<8x16xbf16>
    %26 = vector.extract_strided_slice %20 {offsets = [0, 0], sizes = [8, 16], strides = [1, 1]} : vector<8x32xf32> to vector<8x16xf32>
    %27 = arith.truncf %26 : vector<8x16xf32> to vector<8x16xbf16>
    %cst_11 = arith.constant dense<0.000000e+00> : vector<8x8xf32>
    %28 = tpu.matmul %23, %25, %cst_11 {dimension_numbers = #tpu.dot_dimension_numbers<[1], [1], [0], [0], [0, 0, 1, 0], [], []>} : vector<8x16xbf16>, vector<8x16xbf16>, vector<8x8xf32> -> vector<8x8xf32>
    %29 = vector.broadcast %21 : vector<1x8xf32> to vector<8x8xf32>
    %30 = arith.addf %28, %29 : vector<8x8xf32>
    %cst_12 = arith.constant dense<0xFF800000> : vector<8xf32>
    %31 = vector.multi_reduction <maximumf>, %30, %cst_12 [1] : vector<8x8xf32> to vector<8xf32>
    %32 = vector.shape_cast %31 : vector<8xf32> to vector<8x1xf32>
    %33 = vector.broadcast %32 : vector<8x1xf32> to vector<8x8xf32>
    %34 = arith.subf %30, %33 : vector<8x8xf32>
    %35 = math.exp %34 : vector<8x8xf32>
    %cst_13 = arith.constant dense<0.000000e+00> : vector<8xf32>
    %36 = vector.multi_reduction <add>, %35, %cst_13 [1] : vector<8x8xf32> to vector<8xf32>
    %37 = vector.shape_cast %36 : vector<8xf32> to vector<8x1xf32>
    %38 = tpu.reciprocal %37 {approx = true} : vector<8x1xf32> -> vector<8x1xf32>
    %39 = vector.broadcast %38 : vector<8x1xf32> to vector<8x8xf32>
    %40 = arith.mulf %35, %39 : vector<8x8xf32>
    %41 = arith.truncf %40 : vector<8x8xf32> to vector<8x8xbf16>
    %cst_14 = arith.constant dense<0.000000e+00> : vector<8x16xf32>
    %42 = tpu.matmul %41, %27, %cst_14 {dimension_numbers = #tpu.dot_dimension_numbers<[1], [0], [0], [1], [0, 0, 1, 1], [], []>} : vector<8x8xbf16>, vector<8x16xbf16>, vector<8x16xf32> -> vector<8x16xf32>
    %43 = vector.extract_strided_slice %18 {offsets = [0, 16], sizes = [8, 16], strides = [1, 1]} : vector<8x32xf32> to vector<8x16xf32>
    %44 = arith.truncf %43 : vector<8x16xf32> to vector<8x16xbf16>
    %45 = vector.extract_strided_slice %19 {offsets = [0, 16], sizes = [8, 16], strides = [1, 1]} : vector<8x32xf32> to vector<8x16xf32>
    %46 = arith.truncf %45 : vector<8x16xf32> to vector<8x16xbf16>
    %47 = vector.extract_strided_slice %20 {offsets = [0, 16], sizes = [8, 16], strides = [1, 1]} : vector<8x32xf32> to vector<8x16xf32>
    %48 = arith.truncf %47 : vector<8x16xf32> to vector<8x16xbf16>
    %cst_15 = arith.constant dense<0.000000e+00> : vector<8x8xf32>
    %49 = tpu.matmul %44, %46, %cst_15 {dimension_numbers = #tpu.dot_dimension_numbers<[1], [1], [0], [0], [0, 0, 1, 0], [], []>} : vector<8x16xbf16>, vector<8x16xbf16>, vector<8x8xf32> -> vector<8x8xf32>
    %50 = vector.broadcast %21 : vector<1x8xf32> to vector<8x8xf32>
    %51 = arith.addf %49, %50 : vector<8x8xf32>
    %cst_16 = arith.constant dense<0xFF800000> : vector<8xf32>
    %52 = vector.multi_reduction <maximumf>, %51, %cst_16 [1] : vector<8x8xf32> to vector<8xf32>
    %53 = vector.shape_cast %52 : vector<8xf32> to vector<8x1xf32>
    %54 = vector.broadcast %53 : vector<8x1xf32> to vector<8x8xf32>
    %55 = arith.subf %51, %54 : vector<8x8xf32>
    %56 = math.exp %55 : vector<8x8xf32>
    %cst_17 = arith.constant dense<0.000000e+00> : vector<8xf32>
    %57 = vector.multi_reduction <add>, %56, %cst_17 [1] : vector<8x8xf32> to vector<8xf32>
    %58 = vector.shape_cast %57 : vector<8xf32> to vector<8x1xf32>
    %59 = tpu.reciprocal %58 {approx = true} : vector<8x1xf32> -> vector<8x1xf32>
    %60 = vector.broadcast %59 : vector<8x1xf32> to vector<8x8xf32>
    %61 = arith.mulf %56, %60 : vector<8x8xf32>
    %62 = arith.truncf %61 : vector<8x8xf32> to vector<8x8xbf16>
    %cst_18 = arith.constant dense<0.000000e+00> : vector<8x16xf32>
    %63 = tpu.matmul %62, %48, %cst_18 {dimension_numbers = #tpu.dot_dimension_numbers<[1], [0], [0], [1], [0, 0, 1, 1], [], []>} : vector<8x8xbf16>, vector<8x16xbf16>, vector<8x16xf32> -> vector<8x16xf32>
    %64 = tpu.concatenate %42, %63 in 1 : vector<8x16xf32>, vector<8x16xf32> -> vector<8x32xf32>
    %65 = vector.extract_strided_slice %14 {offsets = [8, 0], sizes = [8, 32], strides = [1, 1]} : vector<16x32xf32> to vector<8x32xf32>
    %66 = vector.extract_strided_slice %15 {offsets = [8, 0], sizes = [8, 32], strides = [1, 1]} : vector<16x32xf32> to vector<8x32xf32>
    %67 = vector.extract_strided_slice %16 {offsets = [8, 0], sizes = [8, 32], strides = [1, 1]} : vector<16x32xf32> to vector<8x32xf32>
    %68 = vector.extract_strided_slice %17 {offsets = [1, 0], sizes = [1, 8], strides = [1, 1]} : vector<2x8xf32> to vector<1x8xf32>
    %69 = vector.extract_strided_slice %65 {offsets = [0, 0], sizes = [8, 16], strides = [1, 1]} : vector<8x32xf32> to vector<8x16xf32>
    %70 = arith.truncf %69 : vector<8x16xf32> to vector<8x16xbf16>
    %71 = vector.extract_strided_slice %66 {offsets = [0, 0], sizes = [8, 16], strides = [1, 1]} : vector<8x32xf32> to vector<8x16xf32>
    %72 = arith.truncf %71 : vector<8x16xf32> to vector<8x16xbf16>
    %73 = vector.extract_strided_slice %67 {offsets = [0, 0], sizes = [8, 16], strides = [1, 1]} : vector<8x32xf32> to vector<8x16xf32>
    %74 = arith.truncf %73 : vector<8x16xf32> to vector<8x16xbf16>
    %cst_19 = arith.constant dense<0.000000e+00> : vector<8x8xf32>
    %75 = tpu.matmul %70, %72, %cst_19 {dimension_numbers = #tpu.dot_dimension_numbers<[1], [1], [0], [0], [0, 0, 1, 0], [], []>} : vector<8x16xbf16>, vector<8x16xbf16>, vector<8x8xf32> -> vector<8x8xf32>
    %76 = vector.broadcast %68 : vector<1x8xf32> to vector<8x8xf32>
    %77 = arith.addf %75, %76 : vector<8x8xf32>
    %cst_20 = arith.constant dense<0xFF800000> : vector<8xf32>
    %78 = vector.multi_reduction <maximumf>, %77, %cst_20 [1] : vector<8x8xf32> to vector<8xf32>
    %79 = vector.shape_cast %78 : vector<8xf32> to vector<8x1xf32>
    %80 = vector.broadcast %79 : vector<8x1xf32> to vector<8x8xf32>
    %81 = arith.subf %77, %80 : vector<8x8xf32>
    %82 = math.exp %81 : vector<8x8xf32>
    %cst_21 = arith.constant dense<0.000000e+00> : vector<8xf32>
    %83 = vector.multi_reduction <add>, %82, %cst_21 [1] : vector<8x8xf32> to vector<8xf32>
    %84 = vector.shape_cast %83 : vector<8xf32> to vector<8x1xf32>
    %85 = tpu.reciprocal %84 {approx = true} : vector<8x1xf32> -> vector<8x1xf32>
    %86 = vector.broadcast %85 : vector<8x1xf32> to vector<8x8xf32>
    %87 = arith.mulf %82, %86 : vector<8x8xf32>
    %88 = arith.truncf %87 : vector<8x8xf32> to vector<8x8xbf16>
    %cst_22 = arith.constant dense<0.000000e+00> : vector<8x16xf32>
    %89 = tpu.matmul %88, %74, %cst_22 {dimension_numbers = #tpu.dot_dimension_numbers<[1], [0], [0], [1], [0, 0, 1, 1], [], []>} : vector<8x8xbf16>, vector<8x16xbf16>, vector<8x16xf32> -> vector<8x16xf32>
    %90 = vector.extract_strided_slice %65 {offsets = [0, 16], sizes = [8, 16], strides = [1, 1]} : vector<8x32xf32> to vector<8x16xf32>
    %91 = arith.truncf %90 : vector<8x16xf32> to vector<8x16xbf16>
    %92 = vector.extract_strided_slice %66 {offsets = [0, 16], sizes = [8, 16], strides = [1, 1]} : vector<8x32xf32> to vector<8x16xf32>
    %93 = arith.truncf %92 : vector<8x16xf32> to vector<8x16xbf16>
    %94 = vector.extract_strided_slice %67 {offsets = [0, 16], sizes = [8, 16], strides = [1, 1]} : vector<8x32xf32> to vector<8x16xf32>
    %95 = arith.truncf %94 : vector<8x16xf32> to vector<8x16xbf16>
    %cst_23 = arith.constant dense<0.000000e+00> : vector<8x8xf32>
    %96 = tpu.matmul %91, %93, %cst_23 {dimension_numbers = #tpu.dot_dimension_numbers<[1], [1], [0], [0], [0, 0, 1, 0], [], []>} : vector<8x16xbf16>, vector<8x16xbf16>, vector<8x8xf32> -> vector<8x8xf32>
    %97 = vector.broadcast %68 : vector<1x8xf32> to vector<8x8xf32>
    %98 = arith.addf %96, %97 : vector<8x8xf32>
    %cst_24 = arith.constant dense<0xFF800000> : vector<8xf32>
    %99 = vector.multi_reduction <maximumf>, %98, %cst_24 [1] : vector<8x8xf32> to vector<8xf32>
    %100 = vector.shape_cast %99 : vector<8xf32> to vector<8x1xf32>
    %101 = vector.broadcast %100 : vector<8x1xf32> to vector<8x8xf32>
    %102 = arith.subf %98, %101 : vector<8x8xf32>
    %103 = math.exp %102 : vector<8x8xf32>
    %cst_25 = arith.constant dense<0.000000e+00> : vector<8xf32>
    %104 = vector.multi_reduction <add>, %103, %cst_25 [1] : vector<8x8xf32> to vector<8xf32>
    %105 = vector.shape_cast %104 : vector<8xf32> to vector<8x1xf32>
    %106 = tpu.reciprocal %105 {approx = true} : vector<8x1xf32> -> vector<8x1xf32>
    %107 = vector.broadcast %106 : vector<8x1xf32> to vector<8x8xf32>
    %108 = arith.mulf %103, %107 : vector<8x8xf32>
    %109 = arith.truncf %108 : vector<8x8xf32> to vector<8x8xbf16>
    %cst_26 = arith.constant dense<0.000000e+00> : vector<8x16xf32>
    %110 = tpu.matmul %109, %95, %cst_26 {dimension_numbers = #tpu.dot_dimension_numbers<[1], [0], [0], [1], [0, 0, 1, 1], [], []>} : vector<8x8xbf16>, vector<8x16xbf16>, vector<8x16xf32> -> vector<8x16xf32>
    %111 = tpu.concatenate %89, %110 in 1 : vector<8x16xf32>, vector<8x16xf32> -> vector<8x32xf32>
    %112 = tpu.concatenate %64, %111 in 0 : vector<8x32xf32>, vector<8x32xf32> -> vector<16x32xf32>
    %113 = arith.truncf %112 : vector<16x32xf32> to vector<16x32xbf16>
    %c0_27 = arith.constant 0 : index
    %c0_28 = arith.constant 0 : index
    %c0_29 = arith.constant 0 : index
    %114 = vector.load %arg7[%c0_27, %c0_28, %c0_29] : memref<1x32x32xbf16, #tpu.memory_space<vmem>>, vector<1x32x32xbf16>
    %115 = vector.shape_cast %114 : vector<1x32x32xbf16> to vector<32x32xbf16>
    %cst_30 = arith.constant dense<0.000000e+00> : vector<16x32xf32>
    %116 = tpu.matmul %113, %115, %cst_30 {dimension_numbers = #tpu.dot_dimension_numbers<[1], [0], [0], [1], [0, 0, 1, 1], [], []>} : vector<16x32xbf16>, vector<32x32xbf16>, vector<16x32xf32> -> vector<16x32xf32>
    %c0_31 = arith.constant 0 : index
    %c0_32 = arith.constant 0 : index
    %c0_33 = arith.constant 0 : index
    %117 = vector.load %arg8[%c0_31, %c0_32, %c0_33] : memref<1x1x32xf32, #tpu.memory_space<vmem>>, vector<1x1x32xf32>
    %118 = vector.shape_cast %117 : vector<1x1x32xf32> to vector<1x32xf32>
    %119 = vector.broadcast %118 : vector<1x32xf32> to vector<16x32xf32>
    %120 = arith.addf %116, %119 : vector<16x32xf32>
    %121 = arith.addf %120, %3 : vector<16x32xf32>
    %c0_34 = arith.constant 0 : index
    %c0_35 = arith.constant 0 : index
    %c0_36 = arith.constant 0 : index
    %122 = vector.load %arg9[%c0_34, %c0_35, %c0_36] : memref<1x1x32xf32, #tpu.memory_space<vmem>>, vector<1x1x32xf32>
    %123 = vector.shape_cast %122 : vector<1x1x32xf32> to vector<1x32xf32>
    %c0_37 = arith.constant 0 : index
    %c0_38 = arith.constant 0 : index
    %c0_39 = arith.constant 0 : index
    %124 = vector.load %arg10[%c0_37, %c0_38, %c0_39] : memref<1x1x32xf32, #tpu.memory_space<vmem>>, vector<1x1x32xf32>
    %125 = vector.shape_cast %124 : vector<1x1x32xf32> to vector<1x32xf32>
    %cst_40 = arith.constant dense<0.000000e+00> : vector<16xf32>
    %126 = vector.multi_reduction <add>, %121, %cst_40 [1] : vector<16x32xf32> to vector<16xf32>
    %127 = vector.shape_cast %126 : vector<16xf32> to vector<16x1xf32>
    %cst_41 = arith.constant 3.200000e+01 : f32
    %128 = vector.broadcast %cst_41 : f32 to vector<16x1xf32>
    %129 = arith.divf %127, %128 : vector<16x1xf32>
    %130 = vector.broadcast %129 : vector<16x1xf32> to vector<16x32xf32>
    %131 = arith.subf %121, %130 : vector<16x32xf32>
    %132 = arith.mulf %131, %131 : vector<16x32xf32>
    %cst_42 = arith.constant dense<0.000000e+00> : vector<16xf32>
    %133 = vector.multi_reduction <add>, %132, %cst_42 [1] : vector<16x32xf32> to vector<16xf32>
    %134 = vector.shape_cast %133 : vector<16xf32> to vector<16x1xf32>
    %cst_43 = arith.constant 3.200000e+01 : f32
    %135 = vector.broadcast %cst_43 : f32 to vector<16x1xf32>
    %136 = arith.divf %134, %135 : vector<16x1xf32>
    %137 = vector.broadcast %129 : vector<16x1xf32> to vector<16x32xf32>
    %138 = arith.subf %121, %137 : vector<16x32xf32>
    %cst_44 = arith.constant 9.99999996E-13 : f32
    %139 = vector.broadcast %cst_44 : f32 to vector<16x1xf32>
    %140 = arith.addf %136, %139 : vector<16x1xf32>
    %141 = math.rsqrt %140 : vector<16x1xf32>
    %142 = vector.broadcast %141 : vector<16x1xf32> to vector<16x32xf32>
    %143 = arith.mulf %138, %142 : vector<16x32xf32>
    %144 = vector.broadcast %123 : vector<1x32xf32> to vector<16x32xf32>
    %145 = arith.mulf %143, %144 : vector<16x32xf32>
    %146 = vector.broadcast %125 : vector<1x32xf32> to vector<16x32xf32>
    %147 = arith.addf %145, %146 : vector<16x32xf32>
    %148 = arith.truncf %147 : vector<16x32xf32> to vector<16x32xbf16>
    %c0_45 = arith.constant 0 : index
    %c0_46 = arith.constant 0 : index
    %c0_47 = arith.constant 0 : index
    %149 = vector.load %arg11[%c0_45, %c0_46, %c0_47] : memref<1x32x128xbf16, #tpu.memory_space<vmem>>, vector<1x32x128xbf16>
    %150 = vector.shape_cast %149 : vector<1x32x128xbf16> to vector<32x128xbf16>
    %cst_48 = arith.constant dense<0.000000e+00> : vector<16x128xf32>
    %151 = tpu.matmul %148, %150, %cst_48 {dimension_numbers = #tpu.dot_dimension_numbers<[1], [0], [0], [1], [0, 0, 1, 1], [], []>} : vector<16x32xbf16>, vector<32x128xbf16>, vector<16x128xf32> -> vector<16x128xf32>
    %c0_49 = arith.constant 0 : index
    %c0_50 = arith.constant 0 : index
    %c0_51 = arith.constant 0 : index
    %152 = vector.load %arg12[%c0_49, %c0_50, %c0_51] : memref<1x1x128xf32, #tpu.memory_space<vmem>>, vector<1x1x128xf32>
    %153 = vector.shape_cast %152 : vector<1x1x128xf32> to vector<1x128xf32>
    %154 = vector.broadcast %153 : vector<1x128xf32> to vector<16x128xf32>
    %155 = arith.addf %151, %154 : vector<16x128xf32>
    %156 = arith.mulf %155, %155 : vector<16x128xf32>
    %157 = arith.mulf %155, %156 : vector<16x128xf32>
    %cst_52 = arith.constant 4.471500e-02 : f32
    %158 = vector.broadcast %cst_52 : f32 to vector<16x128xf32>
    %159 = arith.mulf %158, %157 : vector<16x128xf32>
    %160 = arith.addf %155, %159 : vector<16x128xf32>
    %cst_53 = arith.constant 0.797884583 : f32
    %161 = vector.broadcast %cst_53 : f32 to vector<16x128xf32>
    %162 = arith.mulf %161, %160 : vector<16x128xf32>
    %163 = math.tanh %162 : vector<16x128xf32>
    %cst_54 = arith.constant 1.000000e+00 : f32
    %164 = vector.broadcast %cst_54 : f32 to vector<16x128xf32>
    %165 = arith.addf %164, %163 : vector<16x128xf32>
    %cst_55 = arith.constant 5.000000e-01 : f32
    %166 = vector.broadcast %cst_55 : f32 to vector<16x128xf32>
    %167 = arith.mulf %166, %165 : vector<16x128xf32>
    %168 = arith.mulf %155, %167 : vector<16x128xf32>
    %169 = arith.truncf %168 : vector<16x128xf32> to vector<16x128xbf16>
    %c0_56 = arith.constant 0 : index
    %c0_57 = arith.constant 0 : index
    %c0_58 = arith.constant 0 : index
    %170 = vector.load %arg13[%c0_56, %c0_57, %c0_58] : memref<1x128x32xbf16, #tpu.memory_space<vmem>>, vector<1x128x32xbf16>
    %171 = vector.shape_cast %170 : vector<1x128x32xbf16> to vector<128x32xbf16>
    %cst_59 = arith.constant dense<0.000000e+00> : vector<16x32xf32>
    %172 = tpu.matmul %169, %171, %cst_59 {dimension_numbers = #tpu.dot_dimension_numbers<[1], [0], [0], [1], [0, 0, 1, 1], [], []>} : vector<16x128xbf16>, vector<128x32xbf16>, vector<16x32xf32> -> vector<16x32xf32>
    %c0_60 = arith.constant 0 : index
    %c0_61 = arith.constant 0 : index
    %c0_62 = arith.constant 0 : index
    %173 = vector.load %arg14[%c0_60, %c0_61, %c0_62] : memref<1x1x32xf32, #tpu.memory_space<vmem>>, vector<1x1x32xf32>
    %174 = vector.shape_cast %173 : vector<1x1x32xf32> to vector<1x32xf32>
    %175 = vector.broadcast %174 : vector<1x32xf32> to vector<16x32xf32>
    %176 = arith.addf %172, %175 : vector<16x32xf32>
    %177 = arith.addf %176, %147 : vector<16x32xf32>
    %c0_63 = arith.constant 0 : index
    %c0_64 = arith.constant 0 : index
    %c0_65 = arith.constant 0 : index
    %178 = vector.load %arg15[%c0_63, %c0_64, %c0_65] : memref<1x1x32xf32, #tpu.memory_space<vmem>>, vector<1x1x32xf32>
    %179 = vector.shape_cast %178 : vector<1x1x32xf32> to vector<1x32xf32>
    %c0_66 = arith.constant 0 : index
    %c0_67 = arith.constant 0 : index
    %c0_68 = arith.constant 0 : index
    %180 = vector.load %arg16[%c0_66, %c0_67, %c0_68] : memref<1x1x32xf32, #tpu.memory_space<vmem>>, vector<1x1x32xf32>
    %181 = vector.shape_cast %180 : vector<1x1x32xf32> to vector<1x32xf32>
    %cst_69 = arith.constant dense<0.000000e+00> : vector<16xf32>
    %182 = vector.multi_reduction <add>, %177, %cst_69 [1] : vector<16x32xf32> to vector<16xf32>
    %183 = vector.shape_cast %182 : vector<16xf32> to vector<16x1xf32>
    %cst_70 = arith.constant 3.200000e+01 : f32
    %184 = vector.broadcast %cst_70 : f32 to vector<16x1xf32>
    %185 = arith.divf %183, %184 : vector<16x1xf32>
    %186 = vector.broadcast %185 : vector<16x1xf32> to vector<16x32xf32>
    %187 = arith.subf %177, %186 : vector<16x32xf32>
    %188 = arith.mulf %187, %187 : vector<16x32xf32>
    %cst_71 = arith.constant dense<0.000000e+00> : vector<16xf32>
    %189 = vector.multi_reduction <add>, %188, %cst_71 [1] : vector<16x32xf32> to vector<16xf32>
    %190 = vector.shape_cast %189 : vector<16xf32> to vector<16x1xf32>
    %cst_72 = arith.constant 3.200000e+01 : f32
    %191 = vector.broadcast %cst_72 : f32 to vector<16x1xf32>
    %192 = arith.divf %190, %191 : vector<16x1xf32>
    %193 = vector.broadcast %185 : vector<16x1xf32> to vector<16x32xf32>
    %194 = arith.subf %177, %193 : vector<16x32xf32>
    %cst_73 = arith.constant 9.99999996E-13 : f32
    %195 = vector.broadcast %cst_73 : f32 to vector<16x1xf32>
    %196 = arith.addf %192, %195 : vector<16x1xf32>
    %197 = math.rsqrt %196 : vector<16x1xf32>
    %198 = vector.broadcast %197 : vector<16x1xf32> to vector<16x32xf32>
    %199 = arith.mulf %194, %198 : vector<16x32xf32>
    %200 = vector.broadcast %179 : vector<1x32xf32> to vector<16x32xf32>
    %201 = arith.mulf %199, %200 : vector<16x32xf32>
    %202 = vector.broadcast %181 : vector<1x32xf32> to vector<16x32xf32>
    %203 = arith.addf %201, %202 : vector<16x32xf32>
    %c0_74 = arith.constant 0 : index
    %c0_75 = arith.constant 0 : index
    %204 = vector.load %arg22[%c0_74, %c0_75] : memref<16x32xf32, #tpu.memory_space<vmem>>, vector<16x32xf32>
    tpu.vector_store %arg22[%c0_74, %c0_75], %203 {strides = array<i32>} : memref<16x32xf32, #tpu.memory_space<vmem>>, vector<16x32xf32>,
    %c1_i32 = arith.constant 1 : i32
    %205 = arith.cmpi eq, %arg0, %c1_i32 : i32
    %206 = arith.extui %205 : i1 to i32
    %c0_i32_76 = arith.constant 0 : i32
    %207 = arith.cmpi ne, %206, %c0_i32_76 : i32
    scf.if %207 {
      %208 = vector.extract_strided_slice %203 {offsets = [0, 0], sizes = [1, 32], strides = [1, 1]} : vector<16x32xf32> to vector<1x32xf32>
      %209 = vector.extract_strided_slice %203 {offsets = [8, 0], sizes = [1, 32], strides = [1, 1]} : vector<16x32xf32> to vector<1x32xf32>
      %210 = tpu.concatenate %208, %209 in 0 : vector<1x32xf32>, vector<1x32xf32> -> vector<2x32xf32>
      %211 = arith.truncf %210 : vector<2x32xf32> to vector<2x32xbf16>
      %c0_77 = arith.constant 0 : index
      %c0_78 = arith.constant 0 : index
      %212 = vector.load %arg17[%c0_77, %c0_78] : memref<32x32xbf16, #tpu.memory_space<vmem>>, vector<32x32xbf16>
      %cst_79 = arith.constant dense<0.000000e+00> : vector<2x32xf32>
      %213 = tpu.matmul %211, %212, %cst_79 {dimension_numbers = #tpu.dot_dimension_numbers<[1], [0], [0], [1], [0, 0, 1, 1], [], []>} : vector<2x32xbf16>, vector<32x32xbf16>, vector<2x32xf32> -> vector<2x32xf32>
      %c0_80 = arith.constant 0 : index
      %c0_81 = arith.constant 0 : index
      %214 = vector.load %arg18[%c0_80, %c0_81] : memref<1x32xf32, #tpu.memory_space<vmem>>, vector<1x32xf32>
      %215 = vector.broadcast %214 : vector<1x32xf32> to vector<2x32xf32>
      %216 = arith.addf %213, %215 : vector<2x32xf32>
      %217 = math.tanh %216 : vector<2x32xf32>
      %218 = arith.truncf %217 : vector<2x32xf32> to vector<2x32xbf16>
      %c0_82 = arith.constant 0 : index
      %c0_83 = arith.constant 0 : index
      %219 = vector.load %arg19[%c0_82, %c0_83] : memref<32x128xbf16, #tpu.memory_space<vmem>>, vector<32x128xbf16>
      %cst_84 = arith.constant dense<0.000000e+00> : vector<2x128xf32>
      %220 = tpu.matmul %218, %219, %cst_84 {dimension_numbers = #tpu.dot_dimension_numbers<[1], [0], [0], [1], [0, 0, 1, 1], [], []>} : vector<2x32xbf16>, vector<32x128xbf16>, vector<2x128xf32> -> vector<2x128xf32>
      %c0_85 = arith.constant 0 : index
      %c0_86 = arith.constant 0 : index
      %221 = vector.load %arg20[%c0_85, %c0_86] : memref<1x128xf32, #tpu.memory_space<vmem>>, vector<1x128xf32>
      %222 = vector.broadcast %221 : vector<1x128xf32> to vector<2x128xf32>
      %223 = arith.addf %220, %222 : vector<2x128xf32>
      %c0_87 = arith.constant 0 : index
      %c0_88 = arith.constant 0 : index
      %224 = vector.load %arg21[%c0_87, %c0_88] : memref<2x128xf32, #tpu.memory_space<vmem>>, vector<2x128xf32>
      tpu.vector_store %arg21[%c0_87, %c0_88], %223 {strides = array<i32>} : memref<2x128xf32, #tpu.memory_space<vmem>>, vector<2x128xf32>,
    } else {
    }
    return
  }
  func.func @transform_0(%arg0: i32) -> (i32, i32) {
    %c0_i32 = arith.constant 0 : i32
    %c0_i32_0 = arith.constant 0 : i32
    %c0_i32_1 = arith.constant 0 : i32
    return %c0_i32, %c0_i32_0 : i32, i32
  }
  func.func @transform_1(%arg0: i32) -> (i32, i32) {
    %c0_i32 = arith.constant 0 : i32
    %c0_i32_0 = arith.constant 0 : i32
    %c0_i32_1 = arith.constant 0 : i32
    return %c0_i32, %c0_i32_0 : i32, i32
  }
  func.func @transform_2(%arg0: i32) -> (i32, i32) {
    %c0_i32 = arith.constant 0 : i32
    %c0_i32_0 = arith.constant 0 : i32
    %c0_i32_1 = arith.constant 0 : i32
    return %c0_i32, %c0_i32_0 : i32, i32
  }
  func.func @transform_3(%arg0: i32) -> (i32, i32) {
    %c0_i32 = arith.constant 0 : i32
    %c0_i32_0 = arith.constant 0 : i32
    %c0_i32_1 = arith.constant 0 : i32
    return %c0_i32, %c0_i32_0 : i32, i32
  }
  func.func @transform_4(%arg0: i32) -> (i32, i32, i32) {
    %c0_i32 = arith.constant 0 : i32
    %c0_i32_0 = arith.constant 0 : i32
    %c0_i32_1 = arith.constant 0 : i32
    return %arg0, %c0_i32, %c0_i32_0 : i32, i32, i32
  }
  func.func @transform_5(%arg0: i32) -> (i32, i32, i32) {
    %c0_i32 = arith.constant 0 : i32
    %c0_i32_0 = arith.constant 0 : i32
    %c0_i32_1 = arith.constant 0 : i32
    return %arg0, %c0_i32, %c0_i32_0 : i32, i32, i32
  }
  func.func @transform_6(%arg0: i32) -> (i32, i32, i32) {
    %c0_i32 = arith.constant 0 : i32
    %c0_i32_0 = arith.constant 0 : i32
    %c0_i32_1 = arith.constant 0 : i32
    return %arg0, %c0_i32, %c0_i32_0 : i32, i32, i32
  }
  func.func @transform_7(%arg0: i32) -> (i32, i32, i32) {
    %c0_i32 = arith.constant 0 : i32
    %c0_i32_0 = arith.constant 0 : i32
    %c0_i32_1 = arith.constant 0 : i32
    return %arg0, %c0_i32, %c0_i32_0 : i32, i32, i32
  }
  func.func @transform_8(%arg0: i32) -> (i32, i32, i32) {
    %c0_i32 = arith.constant 0 : i32
    %c0_i32_0 = arith.constant 0 : i32
    %c0_i32_1 = arith.constant 0 : i32
    return %arg0, %c0_i32, %c0_i32_0 : i32, i32, i32
  }
  func.func @transform_9(%arg0: i32) -> (i32, i32, i32) {
    %c0_i32 = arith.constant 0 : i32
    %c0_i32_0 = arith.constant 0 : i32
    %c0_i32_1 = arith.constant 0 : i32
    return %arg0, %c0_i32, %c0_i32_0 : i32, i32, i32
  }
  func.func @transform_10(%arg0: i32) -> (i32, i32, i32) {
    %c0_i32 = arith.constant 0 : i32
    %c0_i32_0 = arith.constant 0 : i32
    %c0_i32_1 = arith.constant 0 : i32
    return %arg0, %c0_i32, %c0_i32_0 : i32, i32, i32
  }
  func.func @transform_11(%arg0: i32) -> (i32, i32, i32) {
    %c0_i32 = arith.constant 0 : i32
    %c0_i32_0 = arith.constant 0 : i32
    %c0_i32_1 = arith.constant 0 : i32
    return %arg0, %c0_i32, %c0_i32_0 : i32, i32, i32
  }
  func.func @transform_12(%arg0: i32) -> (i32, i32, i32) {
    %c0_i32 = arith.constant 0 : i32
    %c0_i32_0 = arith.constant 0 : i32
    %c0_i32_1 = arith.constant 0 : i32
    return %arg0, %c0_i32, %c0_i32_0 : i32, i32, i32
  }
  func.func @transform_13(%arg0: i32) -> (i32, i32, i32) {
    %c0_i32 = arith.constant 0 : i32
    %c0_i32_0 = arith.constant 0 : i32
    %c0_i32_1 = arith.constant 0 : i32
    return %arg0, %c0_i32, %c0_i32_0 : i32, i32, i32
  }
  func.func @transform_14(%arg0: i32) -> (i32, i32, i32) {
    %c0_i32 = arith.constant 0 : i32
    %c0_i32_0 = arith.constant 0 : i32
    %c0_i32_1 = arith.constant 0 : i32
    return %arg0, %c0_i32, %c0_i32_0 : i32, i32, i32
  }
  func.func @transform_15(%arg0: i32) -> (i32, i32, i32) {
    %c0_i32 = arith.constant 0 : i32
    %c0_i32_0 = arith.constant 0 : i32
    %c0_i32_1 = arith.constant 0 : i32
    return %arg0, %c0_i32, %c0_i32_0 : i32, i32, i32
  }
  func.func @transform_16(%arg0: i32) -> (i32, i32) {
    %c0_i32 = arith.constant 0 : i32
    %c0_i32_0 = arith.constant 0 : i32
    %c0_i32_1 = arith.constant 0 : i32
    return %c0_i32, %c0_i32_0 : i32, i32
  }
  func.func @transform_17(%arg0: i32) -> (i32, i32) {
    %c0_i32 = arith.constant 0 : i32
    %c0_i32_0 = arith.constant 0 : i32
    %c0_i32_1 = arith.constant 0 : i32
    return %c0_i32, %c0_i32_0 : i32, i32
  }
  func.func @transform_18(%arg0: i32) -> (i32, i32) {
    %c0_i32 = arith.constant 0 : i32
    %c0_i32_0 = arith.constant 0 : i32
    %c0_i32_1 = arith.constant 0 : i32
    return %c0_i32, %c0_i32_0 : i32, i32
  }
  func.func @transform_19(%arg0: i32) -> (i32, i32) {
    %c0_i32 = arith.constant 0 : i32
    %c0_i32_0 = arith.constant 0 : i32
    %c0_i32_1 = arith.constant 0 : i32
    return %c0_i32, %c0_i32_0 : i32, i32
  }
  func.func @transform_20(%arg0: i32) -> (i32, i32) {
    %c0_i32 = arith.constant 0 : i32
    %c0_i32_0 = arith.constant 0 : i32
    %c0_i32_1 = arith.constant 0 : i32
    return %c0_i32, %c0_i32_0 : i32, i32
  }
}

</mosaic_0001>

<bundles_post_ra>
// kernel: nn_classifier_forward.1
= control target key start
LH: loop header
LB: loop body
LE: loop exit
PB: predicated region body
PF: predicated region fallthrough
CT: control target
= control target key end

     0   :  { %s2796_s0 = inlined_call_operand.vmem [shape: f32[16,32], index: 0, kind: input, shape index: {}]   ;;  %s2797_s1 = inlined_call_operand.vmem [shape: f32[1,32], index: 1, kind: input, shape index: {}]   ;;  %s2798_s2 = inlined_call_operand.vmem [shape: f32[1,32], index: 2, kind: input, shape index: {}]   ;;  %s2799_s3 = inlined_call_operand.vmem [shape: f32[2,8], index: 3, kind: input, shape index: {}]   ;;  %s2800_s4 = inlined_call_operand.vmem [shape: bf16[2,32,96], index: 4, kind: input, shape index: {}]   ;;  %s2801_s5 = inlined_call_operand.vmem [shape: f32[2,1,96], index: 5, kind: input, shape index: {}]   ;;  %s2802_s6 = inlined_call_operand.vmem [shape: bf16[2,32,32], index: 6, kind: input, shape index: {}]   ;;  %s2803_s7 = inlined_call_operand.vmem [shape: f32[2,1,32], index: 7, kind: input, shape index: {}]   ;;  %s2804_s8 = inlined_call_operand.vmem [shape: f32[2,1,32], index: 8, kind: input, shape index: {}]   ;;  %s2805_s9 = inlined_call_operand.vmem [shape: f32[2,1,32], index: 9, kind: input, shape index: {}]   ;;  %s2806_s10 = inlined_call_operand.vmem [shape: bf16[2,32,128], index: 10, kind: input, shape index: {}]   ;;  %s2807_s11 = inlined_call_operand.vmem [shape: f32[2,1,128], index: 11, kind: input, shape index: {}]   ;;  %s2808_s12 = inlined_call_operand.vmem [shape: bf16[2,128,32], index: 12, kind: input, shape index: {}]   ;;  %s2809_s13 = inlined_call_operand.vmem [shape: f32[2,1,32], index: 13, kind: input, shape index: {}]   ;;  %s2810_s14 = inlined_call_operand.vmem [shape: f32[2,1,32], index: 14, kind: input, shape index: {}]   ;;  %s2811_s15 = inlined_call_operand.vmem [shape: f32[2,1,32], index: 15, kind: input, shape index: {}]   ;;  %s2812_s16 = inlined_call_operand.vmem [shape: bf16[32,32], index: 16, kind: input, shape index: {}]   ;;  %s2813_s17 = inlined_call_operand.vmem [shape: f32[1,32], index: 17, kind: input, shape index: {}]   ;;  %s2814_s18 = inlined_call_operand.vmem [shape: bf16[32,128], index: 18, kind: input, shape index: {}]   ;;  %s2815_s19 = inlined_call_operand.vmem [shape: f32[1,128], index: 19, kind: input, shape index: {}]   ;;  %s2816_s20 = inlined_call_operand.hbm [shape: f32[2,128], index: 20, kind: output, shape index: {}]  }
   0x1   :  { %2822 = sst [smem:[#allocation7_spill]] %s2796_s0 }
   0x2   :  { %2823 = sst [smem:[#allocation8_spill]] %s2797_s1 }
   0x3   :  { %2824 = sst [smem:[#allocation9_spill]] %s2798_s2 }
   0x4   :  { %2825 = sst [smem:[#allocation10_spill]] %s2799_s3 }
   0x5   :  { %2826 = sst [smem:[#allocation11_spill]] %s2800_s4 }
   0x6   :  { %2827 = sst [smem:[#allocation12_spill]] %s2802_s6 }
   0x7   :  { %2828 = sst [smem:[#allocation13_spill]] %s2812_s16 }
   0x8   :  { %2829 = sst [smem:[#allocation14_spill]] %s2813_s17 }
   0x9   :  { %2830 = sst [smem:[#allocation15_spill]] %s2814_s18 }
   0xa   :  { %2831 = sst [smem:[#allocation16_spill]] %s2815_s19 }
   0xb   :  { %2832 = sst [smem:[#allocation17_spill]] %s2816_s20 }
   0xc   :  { %25 = vsyncpa [#allocation4], 0  ;;  %s2492_s1 = smov 0  }
   0xd LB: > { %2833 = sst [smem:[#allocation6_spill]] %s2374_s1  ;;  %s2498_s22 = sadd.s32 4294967295, %s2374_s1   ;;  %s2374_s1 = sphi %s2492_s1, %s31_s1  }
   0xe   : > { %p2046_p0 = scmp.ge.s32.totalorder %s2374_s1, 1  ;;  %p652_p1 = scmp.lt.s32.totalorder %s2374_s1, 3 }
  0x10   : > { %p653_p2 = pnand %p2046_p0, %p652_p1 }
  0x11   : > { %p744_p3 = scmp.lt.s32.totalorder (!%p653_p2), %s2498_s22, 1  ;;  %s2834_s28 = sld [smem:[#allocation11_spill]] (!%p653_p2) }
  0x12   : > { %656 = sbr.rel (%p653_p2) target bundleno = 3411 (0xd53), region = 100  ;;  %s2835_s6 = sld [smem:[#allocation12_spill]] (!%p653_p2) }
  0x13   : > { %p2055_p4 = scmp.ne.s32.totalorder (!%p653_p2), %s2498_s22, 0 }
  0x19   : > { %s2504_s23 = scalar_select %p744_p3, %s2498_s22, 1 }
  0x1a   : > { %792 = sbr.rel (%p2055_p4) target bundleno = 351 (0x15f), region = 104  ;;  %s2836_s1 = sld [smem:[#allocation7_spill]] (!%p2055_p4)  ;;  %vm797_vm0 = vcmask (!%p2055_p4), 261120  }
  0x1b   : > { %s2104_s24 = sshll.u32 %s2504_s23, 4  ;;  %s2107_s16 = sshll.u32 %s2504_s23, 6 }
  0x1c   : > { %s2514_s4 = scalar_lea.vmem %s2834_s28, %s2104_s24  ;;  %s2519_s0 = scalar_lea.vmem %s2835_s6, %s2104_s24 }
  0x1d   : > { %s2536_s28 = scalar_lea.vmem %s2806_s10, %s2104_s24  ;;  %s2546_s20 = scalar_lea.vmem %s2808_s12, %s2107_s16 }
  0x1e   : > { %s781_s2 = scalar_lea.vmem %s2809_s13, %s2504_s23  ;;  %s784_s26 = scalar_lea.vmem %s2810_s14, %s2504_s23 }
  0x1f   : > { %s787_s18 = scalar_lea.vmem %s2811_s15, %s2504_s23  ;;  %s2838_s17 = sld [smem:[#allocation8_spill]] (!%p2055_p4) }
  0x20   : > { %s2837_s21 = smov (!%p2055_p4), %s2836_s1  ;;  %v793_v0 = vld [vmem:[%s2836_s1] sm:$0xff] (!%p2055_p4)  ;;  %s2839_s24 = sld [smem:[#allocation9_spill]] (!%p2055_p4) }
  0x21   : > { %v794_v1 = vld [vmem:[%s2837_s21 + $0x8] sm:$0xff]  ;;  %v798_v2 = vsel %vm797_vm0, %v793_v0, 0.0 }
  0x22   : > { %799 = vadd.xlane.f32.xlu0 %v798_v2  ;;  %v801_v3 = vsel %vm797_vm0, %v794_v1, 0.0 }
  0x25   : > { %v2056_v21 = vld [vmem:[%s2838_s17] ss:$0 sm:$0xff] }
  0x26   : > { %802 = vadd.xlane.f32.xlu0 %v801_v3  ;;  %v2057_v23 = vld [vmem:[%s2839_s24] ss:$0 sm:$0xff] }
  0xaf   : > { %v800_v4 = vpop.xlane.xlu0 %799 }
  0xb0   : > { %v805_v5 = vmul.f32 0.03125, %v800_v4 }
  0xb2   : > { %v807_v6 = vsub.f32 %v793_v0, %v805_v5 }
  0xb3   : > { %v803_v7 = vpop.xlane.xlu0 %802 }
  0xb4   : > { %v806_v8 = vmul.f32 0.03125, %v803_v7  ;;  %v809_v9 = vmul.f32 %v807_v6, %v807_v6 }
  0xb6   : > { %v808_v10 = vsub.f32 %v794_v1, %v806_v8  ;;  %v811_v11 = vsel %vm797_vm0, %v809_v9, 0.0 }
  0xb7   : > { %812 = vadd.xlane.f32.xlu1 %v811_v11 }
  0xb8   : > { %v810_v12 = vmul.f32 %v808_v10, %v808_v10 }
  0xba   : > { %v814_v13 = vsel %vm797_vm0, %v810_v12, 0.0 }
  0xbb   : > { %815 = vadd.xlane.f32.xlu1 %v814_v13 }
 0x144   : > { %v813_v14 = vpop.xlane.xlu1 %812 }
 0x145   : > { %v817_v15 = vmul.f32 0.03125, %v813_v14 }
 0x147   : > { %v819_v16 = vadd.f32 1e-12, %v817_v15 }
 0x148   : > { %v816_v17 = vpop.xlane.xlu1 %815 }
 0x149   : > { %2281 = vrsqrt.f32 %v819_v16  ;;  %v818_v18 = vmul.f32 0.03125, %v816_v17 }
 0x14b   : > { %v820_v19 = vadd.f32 1e-12, %v818_v18 }
 0x14d   : > { %2283 = vrsqrt.f32 %v820_v19 }
 0x153   : > { %v2282_v20 = vpop.eup %2281 }
 0x154   : > { %v823_v22 = vmul.f32 %v2282_v20, %v807_v6 }
 0x156   : > { %v831_v24 = vmul.f32 %v2056_v21, %v823_v22 }
 0x157   : > { %v2284_v25 = vpop.eup %2283 }
 0x158   : > { %v839_v26 = vadd.f32 %v2057_v23, %v831_v24  ;;  %v824_v27 = vmul.f32 %v2284_v25, %v808_v10 }
 0x15a   : > { %841 = vst.msk [vmem:[#allocation2] sm:$0xff] %vm797_vm0, %v839_v26  ;;  %v832_v28 = vmul.f32 %v2056_v21, %v824_v27 }
 0x15c   : > { %v840_v29 = vadd.f32 %v2057_v23, %v832_v28 }
 0x15e   : > { %842 = vst.msk [vmem:[#allocation2 + $0x8] sm:$0xff] %vm797_vm0, %v840_v29 }
 0x15f PF: > { %v2290_v30 = vld [vmem:[%s2514_s4] sm:$0xff]   ;;  %v2376_v31 = vmov 0.0   ;;  %v2291_v32 = vld [vmem:[%s2514_s4 + $0x8] sm:$0xff]   ;;  %vm2377_vm1 = vmmov 0   ;;  %vm869_vm2 = vcmask 261120   ;;  %s2840_s29 = scalar_lea.vmem %s2801_s5, %s2504_s23  ;;  %s2378_s30 = smov 96   ;;  %v919_v59 = vlaneseq }
 0x160   : > { %2148 = vmatprep.subr.bf16.mxu0 %v2376_v31  ;;  %2168 = vmatprep.subr.bf16.mxu1 %v2376_v31  ;;  %v2058_v36 = vld [vmem:[%s2840_s29] ss:$0 sm:$0xff]  ;;  %s2379_s1 = smov 112   ;;  %s2380_s16 = smov 80   ;;  %vm926_vm3 = vcmask 130048   ;;  %vm973_vm4 = vcmask 64512  }
 0x161   : > { %2149 = vmatpush3.bf16.msra.mxu0 %v2290_v30  ;;  %2152 = vmatprep.mubr.msk.bf16.mxu0 %vm2377_vm1, %v2376_v31  ;;  %v2585_v33 = vld [vmem:[#allocation2] sm:$0xff]  ;;  %v920_v60 = vshrl.u32 %v919_v59, 7  ;;  %s2841_s17 = sld [smem:[#allocation10_spill]]  ;;  %s2381_s19 = smov 64   ;;  %vm991_vm5 = vcmask 1043456  }
 0x162   : > { %2150 = vmatprep.subr.bf16.mxu0 %v2376_v31  ;;  %2170 = vmatprep.mubr.msk.bf16.mxu1 %vm2377_vm1, %v2376_v31  ;;  %s2382_s25 = smov 48   ;;  %s2383_s24 = smov 16  }
 0x163   : > { %v921_v61 = vsub.s32 0, %v920_v60  ;;  %v1155_v9 = vsub.s32 1, %v920_v60  ;;  %s2842_s27 = scalar_lea.vmem %s2803_s7, %s2504_s23  ;;  %s2844_s6 = scalar_lea.vmem %s2805_s9, %s2504_s23 }
 0x164   : > { %p2091_p5 = scmp.ne.s32.totalorder %s2498_s22, 1 }
 0x165   : > { %v2587_v34 = vld [vmem:[#allocation2 + $0x8] sm:$0xff]  ;;  %2151 = vmatpush3.bf16.msra.mxu0 %v2291_v32  ;;  %s2846_s29 = sld [smem:[#allocation13_spill]] (!%p2091_p5)  ;;  %vm2385_vm6 = vmmov (!%p2091_p5), 0   ;;  %vm1751_vm7 = vcmask (!%p2091_p5), 1040384  }
 0x166   : > { %v845_v35 = vpack.c.bf16 %v2587_v34, %v2585_v33  ;;  %2156 = vmatprep.subr.bf16.mxu0 %v2376_v31 }
 0x167   : > { %v916_v62 = vld [vmem:[%s2841_s17] sm:$0x3] }
 0x168   : > { %2153 = vmatmul.mubr.msk.bf16.vlgmr.msra.gmra.mrb[0].mxu0 %vm869_vm2, %v845_v35  ;;  %v922_v63 = vrot.slane %v916_v62, %v921_v61  ;;  %v1156_v13 = vrot.slane %v916_v62, %v1155_v9  ;;  %v2292_v9 = vld [vmem:[%s2519_s0] sm:$0xff]  }
 0x169   : > { %2158 = vmatprep.mubr.msk.bf16.mxu0 %vm2377_vm1, %v2376_v31 }
 0x23b   : > { %v907_v37 = vpop.f32.mrb[0].mxu0 }
 0x23c   : > { %v908_v38 = vadd.f32 %v2058_v36, %v907_v37  ;;  %v2154_v39 = vpop.f32.mrb[1].mxu0 }
 0x23d   : > { %v910_v40 = vpop.f32.mrb[2].mxu0 }
 0x23e   : > { %v2603_v41 = vpack.c.bf16 %v908_v38, %v908_v38  ;;  %v2155_v42 = vpop.f32.mrb[3].mxu0  ;;  %v914_v43 = vmul.f32 0.25, %v908_v38  ;;  %v911_v44 = vadd.f32 %v2058_v36, %v910_v40 }
 0x240   : > { %924 = vrot.lane.b32.xlu0 %v2603_v41, %s2378_s30  ;;  %v917_v45 = vpack.c.bf16 %v914_v43, %v914_v43  ;;  %v915_v46 = vmul.f32 0.25, %v911_v44  ;;  %v2606_v47 = vpack.c.bf16 %v911_v44, %v911_v44 }
 0x242   : > { %1036 = vrot.lane.b32.xlu1 %v917_v45, %s2379_s1  ;;  %v1151_v48 = vpack.c.bf16 %v915_v46, %v915_v46 }
 0x244   : > { %1038 = vrot.lane.b32.xlu0 %v2603_v41, %s2380_s16 }
 0x246   : > { %1158 = vrot.lane.b32.xlu1 %v2606_v47, %s2378_s30 }
 0x248   : > { %1269 = vrot.lane.b32.xlu0 %v2606_v47, %s2380_s16 }
 0x24a   : > { %1267 = vrot.lane.b32.xlu1 %v1151_v48, %s2379_s1  ;;  %s2843_s1 = scalar_lea.vmem %s2804_s8, %s2504_s23 }
 0x2b2   : > { %v925_v49 = vpop.permute.xlu0 %924 }
 0x2b3   : > { %v931_v50 = vsel %vm926_vm3, %v925_v49, 0 }
 0x2b4   : > { %2157 = vmatpush3.bf16.xpose.msra.mxu0 %v931_v50  ;;  %v1037_v51 = vpop.permute.xlu1 %1036 }
 0x2b5   : > { %2162 = vmatprep.subr.bf16.mxu0 %v2376_v31 }
 0x2b6   : > { %v1039_v52 = vpop.permute.xlu0 %1038 }
 0x2b7   : > { %v1044_v53 = vsel %vm926_vm3, %v1039_v52, 0 }
 0x2b8   : > { %2169 = vmatpush3.bf16.xpose.msra.mxu1 %v1044_v53  ;;  %v1159_v54 = vpop.permute.xlu1 %1158 }
 0x2b9   : > { %2180 = vmatprep.subr.bf16.mxu1 %v2376_v31  ;;  %v1164_v55 = vsel %vm926_vm3, %v1159_v54, 0 }
 0x2ba   : > { %v1270_v56 = vpop.permute.xlu0 %1269 }
 0x2bb   : > { %2159 = vmatmul.mubr.msk.bf16.vlgmr.msra.gmra.mrb[4].mxu0 %vm926_vm3, %v917_v45  ;;  %v1275_v57 = vsel %vm926_vm3, %v1270_v56, 0 }
 0x2bc   : > { %2164 = vmatprep.mubr.msk.bf16.mxu0 %vm2377_vm1, %v2376_v31  ;;  %v1268_v58 = vpop.permute.xlu1 %1267 }
 0x2bf   : > { %2171 = vmatmul.mubr.msk.bf16.vlgmr.msra.gmra.mrb[0].mxu1 %vm926_vm3, %v1037_v51 }
 0x2c0   : > { %2181 = vmatpush3.bf16.xpose.msra.mxu1 %v1164_v55  ;;  %2182 = vmatprep.mubr.msk.bf16.mxu1 %vm2377_vm1, %v2376_v31 }
 0x2c1   : > { %2192 = vmatprep.subr.bf16.mxu1 %v2376_v31 }
 0x2c7   : > { %2183 = vmatmul.mubr.msk.bf16.vlgmr.msra.gmra.mrb[4].mxu1 %vm926_vm3, %v1151_v48 }
 0x2c8   : > { %2193 = vmatpush3.bf16.xpose.msra.mxu1 %v1275_v57  ;;  %2194 = vmatprep.mubr.msk.bf16.mxu1 %vm2377_vm1, %v2376_v31 }
 0x2c9   : > { %2204 = vmatprep.subr.bf16.mxu1 %v2376_v31 }
 0x2cf   : > { %2195 = vmatmul.mubr.msk.bf16.vlgmr.msra.gmra.mrb[8].mxu1 %vm926_vm3, %v1268_v58 }
 0x2d0   : > { %2208 = vmatprep.mubr.msk.bf16.mxu1 %vm2377_vm1, %v2376_v31  ;;  %2205 = vmatpush3.bf16.msra.mxu1 %v2292_v9 }
 0x2d1   : > { %2206 = vmatprep.subr.bf16.mxu1 %v2376_v31 }
 0x38e   : > { %v967_v0 = vpop.f32.mrb[4].mxu0 }
 0x38f   : > { %v968_v1 = vadd.f32 %v967_v0, %v922_v63  ;;  %v2160_v2 = vpop.f32.mrb[5].mxu0 }
 0x390   : > { %v970_v3 = vpop.f32.mrb[6].mxu0 }
 0x391   : > { %v2161_v4 = vpop.f32.mrb[7].mxu0  ;;  %v974_v5 = vsel %vm973_vm4, %v968_v1, -inf }
 0x392   : > { %v1080_v6 = vpop.f32.mrb[0].mxu1  ;;  %975 = vmax.xlane.f32.xlu0 %v974_v5 }
 0x393   : > { %v1081_v7 = vadd.f32 %v1080_v6, %v922_v63  ;;  %v2172_v8 = vpop.f32.mrb[1].mxu1 }
 0x394   : > { %v1083_v10 = vpop.f32.mrb[2].mxu1 }
 0x395   : > { %v2173_v11 = vpop.f32.mrb[3].mxu1  ;;  %v1086_v12 = vsel %vm973_vm4, %v1081_v7, -inf }
 0x396   : > { %1087 = vmax.xlane.f32.xlu1 %v1086_v12 }
 0x39a   : > { %v1200_v14 = vpop.f32.mrb[4].mxu1 }
 0x39b   : > { %v1201_v15 = vadd.f32 %v1200_v14, %v1156_v13  ;;  %v2184_v16 = vpop.f32.mrb[5].mxu1 }
 0x39c   : > { %v1203_v17 = vpop.f32.mrb[6].mxu1 }
 0x39d   : > { %v2185_v18 = vpop.f32.mrb[7].mxu1  ;;  %v1206_v19 = vsel %vm973_vm4, %v1201_v15, -inf }
 0x39e   : > { %1207 = vmax.xlane.f32.xlu0 %v1206_v19  ;;  %v2293_v18 = vld [vmem:[%s2519_s0 + $0x8] sm:$0xff]  }
 0x39f   : > { %2207 = vmatpush3.bf16.msra.mxu1 %v2293_v18  ;;  %v2303_v18 = vld [vmem:[%s2546_s20 + $0x38] sm:$0xff]  }
 0x3a0   : > { %2220 = vmatprep.subr.bf16.mxu1 %v2376_v31 }
 0x3a2   : > { %v1311_v20 = vpop.f32.mrb[8].mxu1 }
 0x3a3   : > { %v1312_v21 = vadd.f32 %v1311_v20, %v1156_v13  ;;  %v2196_v22 = vpop.f32.mrb[9].mxu1 }
 0x3a4   : > { %v1314_v23 = vpop.f32.mrb[10].mxu1 }
 0x3a5   : > { %v2197_v24 = vpop.f32.mrb[11].mxu1  ;;  %v1317_v25 = vsel %vm973_vm4, %v1312_v21, -inf }
 0x3a6   : > { %1318 = vmax.xlane.f32.xlu0 %v1317_v25 }
 0x41f   : > { %v976_v26 = vpop.xlane.xlu0 %975 }
 0x420   : > { %v977_v27 = vsub.f32 %v968_v1, %v976_v26 }
 0x422   : > { %v978_v28 = vmul.f32 1.442695, %v977_v27 }
 0x423   : > { %v1088_v29 = vpop.xlane.xlu1 %1087 }
 0x424   : > { %2304 = vpow2.f32 %v978_v28  ;;  %v1089_v30 = vsub.f32 %v1081_v7, %v1088_v29 }
 0x426   : > { %v1090_v32 = vmul.f32 1.442695, %v1089_v30 }
 0x428   : > { %2306 = vpow2.f32 %v1090_v32 }
 0x42b   : > { %v1208_v36 = vpop.xlane.xlu0 %1207 }
 0x42c   : > { %v1209_v46 = vsub.f32 %v1201_v15, %v1208_v36 }
 0x42e   : > { %v2305_v35 = vpop.eup %2304  ;;  %v1210_v48 = vmul.f32 1.442695, %v1209_v46 }
 0x42f   : > { %v980_v37 = vsel %vm973_vm4, %v2305_v35, 0.0 }
 0x430   : > { %981 = vadd.xlane.f32.xlu1 %v980_v37  ;;  %v2070_v37 = vld [vmem:[%s2842_s27] ss:$0 sm:$0xff] }
 0x432   : > { %v2307_v38 = vpop.eup %2306 }
 0x433   : > { %v1319_v39 = vpop.xlane.xlu0 %1318  ;;  %v1092_v40 = vsel %vm973_vm4, %v2307_v38, 0.0 }
 0x434   : > { %v1320_v42 = vsub.f32 %v1312_v21, %v1319_v39  ;;  %1093 = vadd.xlane.f32.xlu0 %v1092_v40 }
 0x436   : > { %v1321_v43 = vmul.f32 1.442695, %v1320_v42 }
 0x438   : > { %2308 = vpow2.f32 %v1321_v43 }
 0x439   : > { %2310 = vpow2.f32 %v1210_v48 }
 0x441   : > { %986 = vrot.lane.b32.xlu1 %v2603_v41, %s2381_s19 }
 0x442   : > { %v2309_v44 = vpop.eup %2308 }
 0x443   : > { %v1323_v45 = vsel %vm973_vm4, %v2309_v44, 0.0  ;;  %v2311_v49 = vpop.eup %2310 }
 0x444   : > { %1324 = vadd.xlane.f32.xlu0 %v1323_v45  ;;  %v1212_v50 = vsel %vm973_vm4, %v2311_v49, 0.0 }
 0x45a   : > { %1098 = vrot.lane.b32.xlu0 %v2603_v41, %s2382_s25 }
 0x465   : > { %1213 = vadd.xlane.f32.xlu1 %v1212_v50 }
 0x476   : > { %1218 = vrot.lane.b32.xlu1 %v2606_v47, %s2381_s19  ;;  %s2845_s19 = scalar_lea.vmem %s2807_s11, %s2504_s23 }
 0x47a   : > { %1329 = vrot.lane.b32.xlu1 %v2606_v47, %s2382_s25 }
 0x4bd   : > { %v982_v51 = vpop.xlane.xlu1 %981 }
 0x4be   : > { %2312 = vrcp.f32 %v982_v51 }
 0x4c1   : > { %v987_v52 = vpop.permute.xlu1 %986  ;;  %v1094_v54 = vpop.xlane.xlu0 %1093 }
 0x4c2   : > { %v993_v53 = vsel %vm991_vm5, %v987_v52, 0  ;;  %2314 = vrcp.f32 %v1094_v54 }
 0x4c3   : > { %2163 = vmatpush3.bf16.msra.mxu0 %v993_v53 }
 0x4c4   : > { %2174 = vmatprep.subr.bf16.mxu0 %v2376_v31 }
 0x4c8   : > { %v2313_v41 = vpop.eup %2312 }
 0x4c9   : > { %v984_v55 = vmul.f32 %v2313_v41, %v2305_v35 }
 0x4cb   : > { %v985_v56 = vpack.c.bf16 %v984_v55, %v984_v55 }
 0x4cc   : > { %v2315_v47 = vpop.eup %2314 }
 0x4cd   : > { %2165 = vmatmul.mubr.msk.bf16.vlgmr.msra.gmra.mrb[8].mxu0 %vm973_vm4, %v985_v56  ;;  %v1096_v58 = vmul.f32 %v2315_v47, %v2307_v38 }
 0x4ce   : > { %2176 = vmatprep.mubr.msk.bf16.mxu0 %vm2377_vm1, %v2376_v31 }
 0x4cf   : > { %v1097_v61 = vpack.c.bf16 %v1096_v58, %v1096_v58 }
 0x4d1   : > { %v1325_v57 = vpop.xlane.xlu0 %1324 }
 0x4d5   : > { %v1099_v59 = vpop.permute.xlu0 %1098 }
 0x4d6   : > { %v1104_v60 = vsel %vm991_vm5, %v1099_v59, 0 }
 0x4d7   : > { %2175 = vmatpush3.bf16.msra.mxu0 %v1104_v60 }
 0x4d8   : > { %2186 = vmatprep.subr.bf16.mxu0 %v2376_v31 }
 0x4da   : > { %2177 = vmatmul.mubr.msk.bf16.vlgmr.msra.gmra.mrb[12].mxu0 %vm973_vm4, %v1097_v61 }
 0x4db   : > { %2188 = vmatprep.mubr.msk.bf16.mxu0 %vm2377_vm1, %v2376_v31 }
 0x4f2   : > { %v1214_v62 = vpop.xlane.xlu1 %1213 }
 0x4f3   : > { %2316 = vrcp.f32 %v1214_v62 }
 0x4f4   : > { %2318 = vrcp.f32 %v1325_v57  ;;  %v2295_v57 = vld [vmem:[%s2536_s28 + $0x8] sm:$0xff]  }
 0x4f6   : > { %v1219_v63 = vpop.permute.xlu1 %1218 }
 0x4f7   : > { %v1224_v0 = vsel %vm991_vm5, %v1219_v63, 0 }
 0x4f8   : > { %2187 = vmatpush3.bf16.msra.mxu0 %v1224_v0 }
 0x4f9   : > { %2198 = vmatprep.subr.bf16.mxu0 %v2376_v31 }
 0x4fa   : > { %v1330_v3 = vpop.permute.xlu1 %1329 }
 0x4fb   : > { %v1335_v6 = vsel %vm991_vm5, %v1330_v3, 0 }
 0x4fd   : > { %v2317_v1 = vpop.eup %2316 }
 0x4fe   : > { %v1216_v2 = vmul.f32 %v2317_v1, %v2311_v49  ;;  %v2319_v5 = vpop.eup %2318  ;;  %v2074_v1 = vld [vmem:[%s2843_s1] ss:$0 sm:$0xff] }
 0x4ff   : > { %v1327_v7 = vmul.f32 %v2319_v5, %v2309_v44 }
 0x500   : > { %v1217_v4 = vpack.c.bf16 %v1216_v2, %v1216_v2 }
 0x501   : > { %v1328_v8 = vpack.c.bf16 %v1327_v7, %v1327_v7 }
 0x502   : > { %2189 = vmatmul.mubr.msk.bf16.vlgmr.msra.gmra.mrb[16].mxu0 %vm973_vm4, %v1217_v4 }
 0x503   : > { %2199 = vmatpush3.bf16.msra.mxu0 %v1335_v6  ;;  %2200 = vmatprep.mubr.msk.bf16.mxu0 %vm2377_vm1, %v2376_v31  ;;  %v2075_v6 = vld [vmem:[%s2844_s6] ss:$0 sm:$0xff] }
 0x504   : > { %2212 = vmatprep.subr.bf16.mxu0 %v2376_v31 }
 0x50a   : > { %2201 = vmatmul.mubr.msk.bf16.vlgmr.msra.gmra.mrb[20].mxu0 %vm973_vm4, %v1328_v8 }
 0x50b   : > { %2216 = vmatprep.mubr.msk.bf16.mxu0 %vm2377_vm1, %v2376_v31 }
 0x5a0   : > { %v1029_v10 = vpop.f32.mrb[8].mxu0 }
 0x5a1   : > { %v2166_v11 = vpop.f32.mrb[9].mxu0 }
 0x5a2   : > { %v1032_v12 = vpop.f32.mrb[10].mxu0  ;;  %v2296_v11 = vld [vmem:[%s2546_s20] sm:$0xff]  }
 0x5a3   : > { %v2167_v13 = vpop.f32.mrb[11].mxu0  ;;  %v2297_v12 = vld [vmem:[%s2546_s20 + $0x8] sm:$0xff]  }
 0x5a4   : > { %v2298_v13 = vld [vmem:[%s2546_s20 + $0x10] sm:$0xff]  }
 0x5ad   : > { %v1140_v14 = vpop.f32.mrb[12].mxu0 }
 0x5ae   : > { %v2178_v15 = vpop.f32.mrb[13].mxu0 }
 0x5af   : > { %v1143_v16 = vpop.f32.mrb[14].mxu0  ;;  %v2300_v15 = vld [vmem:[%s2546_s20 + $0x20] sm:$0xff]  }
 0x5b0   : > { %v2179_v17 = vpop.f32.mrb[15].mxu0  ;;  %v2301_v16 = vld [vmem:[%s2546_s20 + $0x28] sm:$0xff]  }
 0x5b1   : > { %v2302_v17 = vld [vmem:[%s2546_s20 + $0x30] sm:$0xff]  }
 0x5d5   : > { %v1260_v19 = vpop.f32.mrb[16].mxu0 }
 0x5d6   : > { %v2190_v20 = vpop.f32.mrb[17].mxu0 }
 0x5d7   : > { %v1263_v21 = vpop.f32.mrb[18].mxu0 }
 0x5d8   : > { %v2191_v22 = vpop.f32.mrb[19].mxu0 }
 0x5dd   : > { %v1371_v23 = vpop.f32.mrb[20].mxu0 }
 0x5de   : > { %v2285_v24 = vpack.i.bf16 %v1371_v23, %v1140_v14  ;;  %v2202_v25 = vpop.f32.mrb[21].mxu0  ;;  %v2299_v14 = vld [vmem:[%s2546_s20 + $0x18] sm:$0xff]  }
 0x5df   : > { %v1374_v26 = vpop.f32.mrb[22].mxu0 }
 0x5e0   : > { %2286 = vrot.lane.b32.xlu0 %v2285_v24, %s2383_s24  ;;  %v2203_v27 = vpop.f32.mrb[23].mxu0 }
 0x652   : > { %v2287_v28 = vpop.permute.xlu0 %2286 }
 0x653   : > { %v2289_v29 = vunpack.i.h.bf16 %v2287_v28  ;;  %v2288_v30 = vunpack.i.l.bf16 %v2287_v28 }
 0x655   : > { %v1381_v32 = vsel %vm926_vm3, %v1260_v19, %v2289_v29  ;;  %v1150_v35 = vsel %vm926_vm3, %v1029_v10, %v2288_v30  ;;  %v2076_v19 = vld [vmem:[%s2845_s19] ss:$0 sm:$0xff]  ;;  %s2848_s19 = sld [smem:[#allocation14_spill]] (!%p2091_p5) }
 0x656   : > { %v1382_v36 = vpack.c.bf16 %v1381_v32, %v1150_v35 }
 0x658   : > { %2209 = vmatmul.mubr.msk.bf16.vlgmr.msra.gmra.mrb[12].mxu1 %vm869_vm2, %v1382_v36 }
 0x659   : > { %2236 = vmatprep.mubr.msk.bf16.mxu1 %vm2377_vm1, %v2376_v31  ;;  %2221 = vmatpush3.bf16.msra.mxu1 %v2296_v11 }
 0x65a   : > { %2222 = vmatprep.subr.bf16.mxu1 %v2376_v31 }
 0x65d   : > { %2223 = vmatpush3.bf16.msra.mxu1 %v2297_v12  ;;  %v2090_v12 = vld [vmem:[%s787_s18] ss:$0 sm:$0xff] }
 0x65e   : > { %2224 = vmatprep.subr.bf16.mxu1 %v2376_v31 }
 0x661   : > { %2225 = vmatpush3.bf16.msra.mxu1 %v2298_v13 }
 0x662   : > { %2226 = vmatprep.subr.bf16.mxu1 %v2376_v31 }
 0x665   : > { %2227 = vmatpush3.bf16.msra.mxu1 %v2299_v14 }
 0x666   : > { %2228 = vmatprep.subr.bf16.mxu1 %v2376_v31 }
 0x669   : > { %2229 = vmatpush3.bf16.msra.mxu1 %v2300_v15 }
 0x66a   : > { %2230 = vmatprep.subr.bf16.mxu1 %v2376_v31 }
 0x66d   : > { %2231 = vmatpush3.bf16.msra.mxu1 %v2301_v16 }
 0x66e   : > { %2232 = vmatprep.subr.bf16.mxu1 %v2376_v31 }
 0x671   : > { %2233 = vmatpush3.bf16.msra.mxu1 %v2302_v17 }
 0x672   : > { %2234 = vmatprep.subr.bf16.mxu1 %v2376_v31 }
 0x675   : > { %2235 = vmatpush3.bf16.msra.mxu1 %v2303_v18  ;;  %v2332_v18 = vld [vmem:[%s2846_s29] sm:$0xff] (!%p2091_p5)  }
 0x72b   : > { %v1443_v38 = vpop.f32.mrb[12].mxu1 }
 0x72c   : > { %v1444_v39 = vadd.f32 %v2070_v37, %v1443_v38  ;;  %v2210_v40 = vpop.f32.mrb[13].mxu1 }
 0x72d   : > { %v1446_v42 = vpop.f32.mrb[14].mxu1 }
 0x72e   : > { %v1447_v43 = vadd.f32 %v2070_v37, %v1446_v42  ;;  %v2211_v44 = vpop.f32.mrb[15].mxu1  ;;  %v1450_v45 = vadd.f32 %v1444_v39, %v2585_v33 }
 0x730   : > { %v1454_v46 = vsel %vm869_vm2, %v1450_v45, 0.0  ;;  %v1451_v48 = vadd.f32 %v1447_v43, %v2587_v34  ;;  %v2294_v34 = vld [vmem:[%s2536_s28] sm:$0xff]   ;;  %s2847_s28 = sld [smem:[#allocation15_spill]] (!%p2091_p5) }
 0x731   : > { %1455 = vadd.xlane.f32.xlu1 %v1454_v46  ;;  %2213 = vmatpush3.bf16.msra.mxu0 %v2294_v34 }
 0x732   : > { %v1457_v49 = vsel %vm869_vm2, %v1451_v48, 0.0  ;;  %2214 = vmatprep.subr.bf16.mxu0 %v2376_v31 }
 0x733   : > { %1458 = vadd.xlane.f32.xlu0 %v1457_v49  ;;  %v2080_v49 = vld [vmem:[%s781_s2] ss:$0 sm:$0xff]  ;;  %s2849_s2 = sld [smem:[#allocation16_spill]] (!%p2091_p5) }
 0x735   : > { %2215 = vmatpush3.bf16.msra.mxu0 %v2295_v57 }
 0x7be   : > { %v1456_v50 = vpop.xlane.xlu1 %1455 }
 0x7bf   : > { %v1461_v51 = vmul.f32 0.03125, %v1456_v50 }
 0x7c0   : > { %v1459_v52 = vpop.xlane.xlu0 %1458 }
 0x7c1   : > { %v1463_v53 = vsub.f32 %v1450_v45, %v1461_v51  ;;  %v1462_v54 = vmul.f32 0.03125, %v1459_v52 }
 0x7c3   : > { %v1464_v41 = vsub.f32 %v1451_v48, %v1462_v54  ;;  %v1465_v55 = vmul.f32 %v1463_v53, %v1463_v53 }
 0x7c5   : > { %v1467_v56 = vsel %vm869_vm2, %v1465_v55, 0.0  ;;  %v1466_v33 = vmul.f32 %v1464_v41, %v1464_v41 }
 0x7c6   : > { %1468 = vadd.xlane.f32.xlu0 %v1467_v56 }
 0x7c7   : > { %v1470_v47 = vsel %vm869_vm2, %v1466_v33, 0.0 }
 0x7c8   : > { %1471 = vadd.xlane.f32.xlu1 %v1470_v47 }
 0x853   : > { %v1469_v58 = vpop.xlane.xlu0 %1468 }
 0x854   : > { %v1473_v59 = vmul.f32 0.03125, %v1469_v58 }
 0x855   : > { %v1472_v60 = vpop.xlane.xlu1 %1471 }
 0x856   : > { %v1475_v61 = vadd.f32 1e-12, %v1473_v59  ;;  %v1474_v62 = vmul.f32 0.03125, %v1472_v60 }
 0x858   : > { %2320 = vrsqrt.f32 %v1475_v61  ;;  %v1476_v63 = vadd.f32 1e-12, %v1474_v62 }
 0x85a   : > { %2322 = vrsqrt.f32 %v1476_v63 }
 0x862   : > { %v2321_v0 = vpop.eup %2320 }
 0x863   : > { %v1479_v2 = vmul.f32 %v2321_v0, %v1463_v53 }
 0x864   : > { %v2323_v3 = vpop.eup %2322 }
 0x865   : > { %v1487_v4 = vmul.f32 %v2074_v1, %v1479_v2  ;;  %v1480_v5 = vmul.f32 %v2323_v3, %v1464_v41 }
 0x867   : > { %v1488_v7 = vmul.f32 %v2074_v1, %v1480_v5  ;;  %v2699_v8 = vadd.f32 %v2075_v6, %v1487_v4 }
 0x869   : > { %v2701_v9 = vadd.f32 %v2075_v6, %v1488_v7 }
 0x86b   : > { %v1497_v10 = vpack.c.bf16 %v2701_v9, %v2699_v8 }
 0x86d   : > { %2217 = vmatmul.mubr.msk.bf16.vlgmr.msra.gmra.mrb[24].mxu0 %vm869_vm2, %v1497_v10 }
 0x940   : > { %v1558_v20 = vpop.f32.mrb[24].mxu0 }
 0x941   : > { %v1559_v21 = vadd.f32 %v2076_v19, %v1558_v20  ;;  %v2218_v22 = vpop.f32.mrb[25].mxu0  ;;  %v2333_v20 = vld [vmem:[%s2846_s29 + $0x8] sm:$0xff] (!%p2091_p5)  }
 0x942   : > { %v1561_v23 = vpop.f32.mrb[26].mxu0 }
 0x943   : > { %v1565_v24 = vmul.f32 %v1559_v21, %v1559_v21  ;;  %v1562_v25 = vadd.f32 %v2076_v19, %v1561_v23  ;;  %v2219_v26 = vpop.f32.mrb[27].mxu0  ;;  %v2384_v19 = vmov (!%p2091_p5), 0.0  }
 0x944   : > { %2240 = vmatprep.subr.bf16.mxu0 (!%p2091_p5), %v2384_v19  ;;  %2248 = vmatprep.subr.bf16.mxu1 (!%p2091_p5), %v2384_v19  ;;  %v2092_v26 = vld [vmem:[%s2848_s19] ss:$0 sm:$0xff] (!%p2091_p5) }
 0x945   : > { %v1567_v27 = vmul.f32 %v1565_v24, %v1559_v21  ;;  %v1566_v28 = vmul.f32 %v1562_v25, %v1562_v25  ;;  %2241 = vmatpush3.bf16.msra.mxu0 (!%p2091_p5), %v2332_v18  ;;  %2244 = vmatprep.mubr.msk.bf16.mxu0 (!%p2091_p5), %vm2385_vm6, %v2384_v19  ;;  %v2334_v24 = vld [vmem:[%s2847_s28] sm:$0xff] (!%p2091_p5)  }
 0x946   : > { %2242 = vmatprep.subr.bf16.mxu0 (!%p2091_p5), %v2384_v19 }
 0x947   : > { %v1569_v29 = vmul.f32 0.044715, %v1567_v27  ;;  %v1568_v30 = vmul.f32 %v1566_v28, %v1562_v25 }
 0x949   : > { %v1571_v32 = vadd.f32 %v1569_v29, %v1559_v21  ;;  %v1570_v31 = vmul.f32 0.044715, %v1568_v30  ;;  %2243 = vmatpush3.bf16.msra.mxu0 (!%p2091_p5), %v2333_v20 }
 0x94b   : > { %v1573_v35 = vmul.f32 0.7978846, %v1571_v32  ;;  %v1572_v36 = vadd.f32 %v1570_v31, %v1562_v25 }
 0x94d   : > { %2324 = vtanh.f32 %v1573_v35  ;;  %v1574_v37 = vmul.f32 0.7978846, %v1572_v36  ;;  %v2096_v36 = vld [vmem:[%s2849_s2] ss:$0 sm:$0xff] (!%p2091_p5) }
 0x94f   : > { %2326 = vtanh.f32 %v1574_v37 }
 0x957   : > { %v2325_v38 = vpop.eup %2324 }
 0x958   : > { %v1577_v39 = vadd.f32 1.0, %v2325_v38 }
 0x959   : > { %v2327_v40 = vpop.eup %2326 }
 0x95a   : > { %v1579_v42 = vmul.f32 0.5, %v1577_v39  ;;  %v1578_v43 = vadd.f32 1.0, %v2327_v40 }
 0x95c   : > { %v1580_v44 = vmul.f32 0.5, %v1578_v43  ;;  %v1581_v45 = vmul.f32 %v1579_v42, %v1559_v21 }
 0x95e   : > { %v1582_v46 = vmul.f32 %v1580_v44, %v1562_v25  ;;  %v2335_v25 = vld [vmem:[%s2847_s28 + $0x8] sm:$0xff] (!%p2091_p5)  }
 0x960   : > { %v1583_v48 = vpack.c.bf16 %v1582_v46, %v1581_v45 }
 0x962   : > { %2237 = vmatmul.mubr.bf16.vlgmr.msra.gmra.mrb[16].mxu1 %v1583_v48 }
 0x963   : > { %2252 = vmatprep.mubr.msk.bf16.mxu1 (!%p2091_p5), %vm2385_vm6, %v2384_v19  ;;  %2249 = vmatpush3.bf16.msra.mxu1 (!%p2091_p5), %v2334_v24 }
 0x964   : > { %2250 = vmatprep.subr.bf16.mxu1 (!%p2091_p5), %v2384_v19 }
 0x967   : > { %2251 = vmatpush3.bf16.msra.mxu1 (!%p2091_p5), %v2335_v25 }
 0xa35   : > { %v1689_v50 = vpop.f32.mrb[16].mxu1 }
 0xa36   : > { %v1690_v51 = vadd.f32 %v2080_v49, %v1689_v50  ;;  %v2238_v52 = vpop.f32.mrb[17].mxu1 }
 0xa37   : > { %v1692_v53 = vpop.f32.mrb[18].mxu1 }
 0xa38   : > { %v1693_v54 = vadd.f32 %v2080_v49, %v1692_v53  ;;  %v2239_v41 = vpop.f32.mrb[19].mxu1  ;;  %v1696_v55 = vadd.f32 %v1690_v51, %v2699_v8 }
 0xa3a   : > { %v1700_v56 = vsel %vm869_vm2, %v1696_v55, 0.0  ;;  %v1697_v33 = vadd.f32 %v1693_v54, %v2701_v9  ;;  %v2089_v9 = vld [vmem:[%s784_s26] ss:$0 sm:$0xff] }
 0xa3b   : > { %1701 = vadd.xlane.f32.xlu0 %v1700_v56 }
 0xa3c   : > { %v1703_v47 = vsel %vm869_vm2, %v1697_v33, 0.0 }
 0xa3d   : > { %1704 = vadd.xlane.f32.xlu1 %v1703_v47 }
 0xac8   : > { %v1702_v34 = vpop.xlane.xlu0 %1701 }
 0xac9   : > { %v1706_v57 = vmul.f32 0.03125, %v1702_v34 }
 0xaca   : > { %v1705_v58 = vpop.xlane.xlu1 %1704 }
 0xacb   : > { %v1708_v59 = vsub.f32 %v1696_v55, %v1706_v57  ;;  %v1707_v60 = vmul.f32 0.03125, %v1705_v58 }
 0xacd   : > { %v1709_v61 = vsub.f32 %v1697_v33, %v1707_v60  ;;  %v1710_v62 = vmul.f32 %v1708_v59, %v1708_v59 }
 0xacf   : > { %v1712_v63 = vsel %vm869_vm2, %v1710_v62, 0.0  ;;  %v1711_v0 = vmul.f32 %v1709_v61, %v1709_v61 }
 0xad0   : > { %1713 = vadd.xlane.f32.xlu0 %v1712_v63 }
 0xad1   : > { %v1715_v1 = vsel %vm869_vm2, %v1711_v0, 0.0 }
 0xad2   : > { %1716 = vadd.xlane.f32.xlu1 %v1715_v1 }
 0xb5d   : > { %v1714_v2 = vpop.xlane.xlu0 %1713 }
 0xb5e   : > { %v1718_v3 = vmul.f32 0.03125, %v1714_v2 }
 0xb5f   : > { %v1717_v4 = vpop.xlane.xlu1 %1716 }
 0xb60   : > { %v1720_v5 = vadd.f32 1e-12, %v1718_v3  ;;  %v1719_v6 = vmul.f32 0.03125, %v1717_v4 }
 0xb62   : > { %2328 = vrsqrt.f32 %v1720_v5  ;;  %v1721_v7 = vadd.f32 1e-12, %v1719_v6 }
 0xb64   : > { %2330 = vrsqrt.f32 %v1721_v7 }
 0xb6c   : > { %v2329_v8 = vpop.eup %2328 }
 0xb6d   : > { %v1724_v10 = vmul.f32 %v2329_v8, %v1708_v59 }
 0xb6e   : > { %v2331_v11 = vpop.eup %2330 }
 0xb6f   : > { %v1732_v13 = vmul.f32 %v2089_v9, %v1724_v10  ;;  %v1725_v14 = vmul.f32 %v2331_v11, %v1709_v61  ;;  %1747 = sbr.rel (%p2091_p5) target bundleno = 3380 (0xd34), region = 108 }
 0xb71   : > { %v1740_v15 = vadd.f32 %v2090_v12, %v1732_v13  ;;  %v1733_v16 = vmul.f32 %v2089_v9, %v1725_v14 }
 0xb73   : > { %1742 = vst.msk [vmem:[#allocation2] sm:$0xff] %vm869_vm2, %v1740_v15  ;;  %v1741_v17 = vadd.f32 %v2090_v12, %v1733_v16 }
 0xb75   : > { %1743 = vst.msk [vmem:[#allocation2 + $0x8] sm:$0xff] %vm869_vm2, %v1741_v17  ;;  %v1749_v21 = vrot.slane (!%p2091_p5), %v1741_v17, 7 }
 0xb77   : > { %v1752_v22 = vsel %vm1751_vm7, %v1740_v15, %v1749_v21 }
 0xb78   : > { %v1753_v23 = vpack.c.bf16 %v1752_v22, %v1752_v22 }
 0xb7a   : > { %2245 = vmatmul.mubr.msk.bf16.vlgmr.msra.gmra.mrb[0].mxu0 %vm869_vm2, %v1753_v23 }
 0xc4d   : > { %v1814_v27 = vpop.f32.mrb[0].mxu0 }
 0xc4e   : > { %v1815_v28 = vadd.f32 %v2092_v26, %v1814_v27  ;;  %v2246_v29 = vpop.f32.mrb[1].mxu0 }
 0xc4f   : > { %v1817_v30 = vpop.f32.mrb[2].mxu0 }
 0xc50   : > { %2336 = vtanh.f32 %v1815_v28  ;;  %v2247_v32 = vpop.f32.mrb[3].mxu0 }
 0xc5a   : > { %v2337_v31 = vpop.eup %2336 }
 0xc5b   : > { %v1821_v35 = vpack.c.bf16 %v2337_v31, %v2337_v31 }
 0xc5d   : > { %2253 = vmatmul.mubr.msk.bf16.vlgmr.msra.gmra.mrb[0].mxu1 %vm869_vm2, %v1821_v35 }
 0xd30   : > { %v1882_v37 = vpop.f32.mrb[0].mxu1 }
 0xd31   : > { %v1883_v38 = vadd.f32 %v2096_v36, %v1882_v37  ;;  %v2254_v39 = vpop.f32.mrb[1].mxu1 }
 0xd32   : > { %v1885_v40 = vpop.f32.mrb[2].mxu1 }
 0xd33   : > { %1888 = vst [vmem:[#allocation3] sm:$0x3] %v1883_v38  ;;  %v2255_v42 = vpop.f32.mrb[3].mxu1 }
 0xd34 PF: > { %p2260_p6 = scmp.eq.s32.totalorder %s2498_s22, 1  ;;  %s2386_s24 = smov [#allocation3]  }
 0xd35   : > { %s1896_s0 = sshll.u32 %s2386_s24, 4  ;;  %s1897_s0 = int_to_ptr.vmem [resolvable:$true] %s1896_s0 }
 0xd36   : > { %s2338_s4 = scalar_lea.vmem %s1897_s0, 32  ;;  %p2345_p10 = scmp.lt.s32.totalorder %s1897_s0, %s1897_s0 }
 0xd37   : > { %p2339_p7 = scmp.ne.s32.totalorder %s1897_s0, %s2338_s4  ;;  %p2346_p11 = scmp.lt.s32.totalorder %s2338_s4, %s2338_s4 }
 0xd39   : > { %p2340_p8 = pnand %p2339_p7, %p2260_p6  ;;  %p2347_p12 = por %p2346_p11, %p2345_p10 }
 0xd3b   : > { %p2341_p9 = pneg %p2340_p8 }
 0xd3d   : > { %p2348_p13 = pnand %p2347_p12, %p2341_p9 }
 0xd3f   : > { %2351 = shalt.err (!%p2348_p13)
}
 0xd40   : > { %s2850_s18 = sld [smem:[#allocation17_spill]] }
 0xd46   : > { %s2352_s23 = scalar_lea.hbm %s2850_s18, 32 }
 0xd47   : > { %p2353_p0 = scmp.ne.s32.totalorder %s2850_s18, %s2352_s23  ;;  %p2358_p3 = scmp.lt.u32.totalorder %s2352_s23, %s2850_s18 }
 0xd49   : > { %p2354_p1 = pnand %p2353_p0, %p2260_p6 }
 0xd4b   : > { %p2355_p2 = pneg %p2354_p1 }
 0xd4d   : > { %p2360_p4 = pnand %p2358_p3, %p2355_p2 }
 0xd4f   : > { %2363 = shalt.err (!%p2360_p4)
}
 0xd50   : > { %2257 = dma.vmem_to_hbm [thread:$0]  (%p2260_p6), %s1897_s0, 32, %s2850_s18, [#allocation4]  }
 0xd51   : > { %2369 = dma.done.wait (%p2260_p6), [#allocation4], 32  }
 0xd52   : > { %2371 = vsyncadd (%p2260_p6), [#allocation4], 4294967264 }
 0xd53 PF: > { %s2851_s19 = sld [smem:[#allocation6_spill]] }
 0xd59   : > { %s31_s1 = sadd.s32 1, %s2851_s19  }
 0xd5a   : > { %p28_p5 = scmp.ge.s32.totalorder %s31_s1, 4  }
 0xd5c   :  { %30 = sbr.rel (!%p28_p5) target bundleno = 13 (0xd), region = 168 }
 0xd63   :  { %1909 = vsyncpa [#allocation4], 1 }
 0xd64   :  { %1911 = vsyncpa [#allocation4 + $0x1], 1 }

</bundles_post_ra>
